<compile_context>
chip_gen: v7x
topology: tpu7x:2x2x1
jax: 0.10.0
libtpu: 0.0.40
codegen_flags: <defaults>
</compile_context>

<pallas_src>
import jax
import jax.numpy as jnp
from jax import lax
from jax.experimental import pallas as pl
from jax.experimental.pallas import tpu as pltpu

KERNEL_SIZES = (9, 19, 39)
KMAX = max(KERNEL_SIZES)            # 39
PMAX = KMAX // 2                    # 19 (max "same" padding / shared halo)
TAP_GROUP = 4                       # taps per accumulation pass (4*32 = 128-wide contraction)
KTAPS = 40                          # 39 real taps + 1 zero tap -> 10 uniform groups of 4
BOTTLENECK = 32
BN_EPS = 1e-5
ROW_TARGET = 512                    # target Bt*L matmul rows per grid step


def _vmem_limit_bytes():
    """v5e/v6e have 128 MiB physical VMEM, v7x only 64 MiB; raise the scoped limit above
    the small defaults but keep headroom for double-buffered tiles on every generation."""
    try:
        cap = pltpu.get_tpu_info().vmem_capacity_bytes
        return int(min(max(cap // 2, 32 * 1024 * 1024), 96 * 1024 * 1024))
    except Exception:
        return 32 * 1024 * 1024


def _choose_bt(B, L, row_target=ROW_TARGET):
    """Batch elements per grid step: push M = Bt*L toward `row_target` (MXU row fill +
    per-step overhead amortization) while keeping >= 2 grid steps when B allows so both
    v7x TensorCores are busy."""
    bt = 1
    for c in range(1, B + 1):
        if B % c == 0 and c * L <= row_target:
            bt = c
    if B // bt < 2 and B > 1:
        for c in range(bt - 1, 0, -1):
            if B % c == 0:
                bt = c
                break
    return bt


def build_fused_weight(w_convs, w_mp):
    """Fuse the k=9/19/39 conv weights (each (K, Cb, Co)) and the maxpool-branch 1x1
    weight (Cin, Co) into ONE block-diagonal im2col weight (KTAPS*Cb + Cin, 4*Co).

    Tap k of a kernel with padding P lands at im2col row offset o = k + (PMAX - P), so all
    conv branches share a single PMAX-padded buffer; the maxpool branch occupies the
    trailing Cin contraction rows and the trailing Co output columns (torch.cat order)."""
    Cb, Co = w_convs[0].shape[1], w_convs[0].shape[2]
    Cin = w_mp.shape[0]
    W = jnp.zeros((KTAPS * Cb + Cin, 4 * Co), jnp.float32)
    for j, (w, K) in enumerate(zip(w_convs, KERNEL_SIZES)):
        off = PMAX - K // 2
        W = W.at[off * Cb:(off + K) * Cb, j * Co:(j + 1) * Co].set(
            w.astype(jnp.float32).reshape(K * Cb, Co))
    W = W.at[KTAPS * Cb:, 3 * Co:].set(w_mp.astype(jnp.float32))
    return W.astype(jnp.bfloat16)


def make_block_fn(B, L, Cin, Co, Cb, use_bottleneck, apply_bn, Bt, vmem_limit):
    """Inception-block conv kernel, tiled over the batch axis (Bt elements per step).

    Per step: [blocks>0] previous block's BN(scale/shift)+ReLU prologue, bottleneck 1x1
    conv, single shared PMAX pad, fused k=9/19/39 convs + maxpool(3,1,1)+1x1 branch as
    one accumulated matmul against the fused weight (10 passes of 128-wide contraction
    + 1 maxpool pass), plus per-step BatchNorm partial sums / sums-of-squares."""
    C_total = 4 * Co
    n_grid = B // Bt
    M = Bt * L
    KW = KTAPS * Cb + Cin

    def kernel(*refs):
        it = iter(refs)
        x_ref = next(it)
        sc_ref = next(it) if apply_bn else None
        sh_ref = next(it) if apply_bn else None
        wb_ref = next(it) if use_bottleneck else None
        wf_ref = next(it)
        y_ref, s_ref, ss_ref = next(it), next(it), next(it)

        x = x_ref[...]                                              # (Bt, L, Cin)
        if apply_bn:
            # Previous block's BatchNorm + ReLU, fused here so the post-BN activation
            # never round-trips through HBM.
            x = jnp.maximum(x.astype(jnp.float32) * sc_ref[...] + sh_ref[...], 0.0)
        xin = x.astype(jnp.bfloat16)

        if use_bottleneck:
            xb = jnp.dot(xin.reshape(M, Cin), wb_ref[...],
                         preferred_element_type=jnp.float32).astype(jnp.bfloat16)
            xb = xb.reshape(Bt, L, Cb)
        else:
            xb = xin

        # One pad per sequence to the maximum halo (+1 row for the zero 40th tap).
        xp = jnp.pad(xb, ((0, 0), (PMAX, PMAX + 1), (0, 0)))        # (Bt, L+2*PMAX+1, Cb)

        # maxpool(kernel=3, stride=1, pad=1) on the block input (branch folded below).
        xm = jnp.pad(xin.astype(jnp.float32), ((0, 0), (1, 1), (0, 0)),
                     constant_values=-jnp.inf)
        pooled = jnp.maximum(jnp.maximum(xm[:, 0:L], xm[:, 1:L + 1]), xm[:, 2:L + 2])
        pooled = pooled.astype(jnp.bfloat16)

        # Fused convolution: 10 accumulation passes, each exactly TAP_GROUP*Cb (=128) wide,
        # plus one pass for the maxpool branch.  Output is directly the lane-dense
        # (M, 4*Co = 128) concat [conv9 | conv19 | conv39 | maxpool_conv].
        acc = jnp.zeros((M, C_total), jnp.float32)
        for g in range(KTAPS // TAP_GROUP):
            base = g * TAP_GROUP
            xg = jnp.concatenate(
                [xp[:, base + t:base + t + L, :] for t in range(TAP_GROUP)], axis=-1)
            acc = acc + jnp.dot(xg.reshape(M, TAP_GROUP * Cb),
                                wf_ref[base * Cb:(base + TAP_GROUP) * Cb, :],
                                preferred_element_type=jnp.float32)
        acc = acc + jnp.dot(pooled.reshape(M, Cin),
                            wf_ref[KTAPS * Cb:KTAPS * Cb + Cin, :],
                            preferred_element_type=jnp.float32)

        # Per-grid-step BatchNorm partial statistics (reduced across steps in XLA).
        s_ref[0] = jnp.sum(acc, axis=0, keepdims=True)
        ss_ref[0] = jnp.sum(acc * acc, axis=0, keepdims=True)
        y_ref[...] = acc.reshape(Bt, L, C_total).astype(y_ref.dtype)

    in_specs = [pl.BlockSpec((Bt, L, Cin), lambda b: (b, 0, 0))]
    if apply_bn:
        in_specs += [pl.BlockSpec((1, Cin), lambda b: (0, 0)),
                     pl.BlockSpec((1, Cin), lambda b: (0, 0))]
    if use_bottleneck:
        in_specs += [pl.BlockSpec((Cin, Cb), lambda b: (0, 0))]
    in_specs += [pl.BlockSpec((KW, C_total), lambda b: (0, 0))]

    return pl.pallas_call(
        kernel,
        out_shape=(
            jax.ShapeDtypeStruct((B, L, C_total), jnp.bfloat16),
            jax.ShapeDtypeStruct((n_grid, 1, C_total), jnp.float32),
            jax.ShapeDtypeStruct((n_grid, 1, C_total), jnp.float32),
        ),
        grid=(n_grid,),
        in_specs=in_specs,
        out_specs=(
            pl.BlockSpec((Bt, L, C_total), lambda b: (b, 0, 0)),
            pl.BlockSpec((1, 1, C_total), lambda b: (b, 0, 0)),
            pl.BlockSpec((1, 1, C_total), lambda b: (b, 0, 0)),
        ),
        compiler_params=pltpu.CompilerParams(
            dimension_semantics=("parallel",), vmem_limit_bytes=vmem_limit),
    )


def make_head_fn(B, L, C, Bt, vmem_limit):
    """Last block's BN + ReLU + global average pool, tiled over batch; emits the
    lane-dense pooled (B, 1, C) activations.  The tiny FC runs in plain XLA outside."""
    n_grid = B // Bt
    inv_l = 1.0 / float(L)

    def kernel(y_ref, sc_ref, sh_ref, p_ref):
        act = jnp.maximum(y_ref[...].astype(jnp.float32) * sc_ref[...] + sh_ref[...], 0.0)
        p_ref[...] = jnp.sum(act, axis=1, keepdims=True) * inv_l

    return pl.pallas_call(
        kernel,
        out_shape=jax.ShapeDtypeStruct((B, 1, C), jnp.float32),
        grid=(n_grid,),
        in_specs=[
            pl.BlockSpec((Bt, L, C), lambda b: (b, 0, 0)),
            pl.BlockSpec((1, C), lambda b: (0, 0)),
            pl.BlockSpec((1, C), lambda b: (0, 0)),
        ],
        out_specs=pl.BlockSpec((Bt, 1, C), lambda b: (b, 0, 0)),
        compiler_params=pltpu.CompilerParams(
            dimension_semantics=("parallel",), vmem_limit_bytes=vmem_limit),
    )


def _bn_affine(s, ss, gamma, beta, count):
    """Reduce per-step partial sums to training-mode BatchNorm1d scale/shift.
    Tiny O(C) op kept in XLA between pallas_calls so no per-grid-step kernel redoes the
    O(B*C) reduction / rsqrt."""
    mean = jnp.sum(s, axis=(0, 1)) / count
    var = jnp.maximum(jnp.sum(ss, axis=(0, 1)) / count - mean * mean, 0.0)
    scale = gamma.reshape(-1) * lax.rsqrt(var + BN_EPS)
    shift = beta.reshape(-1) - mean * scale
    return scale[None, :], shift[None, :]


def init_params(key, in_channels, num_blocks, out_channels, num_classes):
    """Random parameters mirroring the PyTorch module's shapes."""
    c_cat = 4 * out_channels
    raw = []
    c_in = in_channels
    for i in range(num_blocks):
        ks = jax.random.split(jax.random.fold_in(key, i), 7)
        use_bneck = BOTTLENECK > 0 and c_in > 1
        cb = BOTTLENECK if use_bneck else c_in
        blk = dict(
            w_convs=tuple(
                0.1 * jax.random.normal(ks[j], (K, cb, out_channels), jnp.float32)
                for j, K in enumerate(KERNEL_SIZES)),
            w_mp=0.1 * jax.random.normal(ks[3], (c_in, out_channels), jnp.float32),
            gamma=1.0 + 0.05 * jax.random.normal(ks[5], (1, c_cat), jnp.float32),
            beta=0.05 * jax.random.normal(ks[6], (1, c_cat), jnp.float32),
        )
        if use_bneck:
            blk["wb"] = 0.1 * jax.random.normal(ks[4], (c_in, cb), jnp.float32)
        raw.append(blk)
        c_in = c_cat
    kf = jax.random.fold_in(key, 10_000)
    fc_w = 0.1 * jax.random.normal(jax.random.fold_in(kf, 0), (c_cat, num_classes), jnp.float32)
    fc_b = 0.05 * jax.random.normal(jax.random.fold_in(kf, 1), (num_classes,), jnp.float32)
    return raw, fc_w, fc_b


def prepare_params(raw_blocks, fc_w, fc_b):
    """One-time parameter preprocessing (hoisted out of the forward pass):
    fused bf16 im2col+maxpool weight per block + bf16 bottleneck weight."""
    blocks = []
    for p in raw_blocks:
        blk = dict(wf=build_fused_weight(p["w_convs"], p["w_mp"]),
                   gamma=p["gamma"], beta=p["beta"])
        if "wb" in p:
            blk["wb"] = p["wb"].astype(jnp.bfloat16)
        blocks.append(blk)
    return dict(blocks=blocks, fc_w=fc_w, fc_b=fc_b)


def inception_time_forward(x_ncl, params):
    """x_ncl: (B, C_in, L) as in the PyTorch module; returns logits (B, num_classes)."""
    blocks, fc_w, fc_b = params["blocks"], params["fc_w"], params["fc_b"]
    B, _, L = x_ncl.shape
    c_cat = blocks[0]["wf"].shape[1]                 # 4 * out_channels
    co = c_cat // 4
    count = float(B * L)
    bt = _choose_bt(B, L)
    vmem_limit = _vmem_limit_bytes()

    # channels-last (B, L, C): channels on the 128-lane axis -> every conv is an MXU matmul
    h = jnp.transpose(x_ncl, (0, 2, 1))

    fn_cache = {}

    def get_block_fn(cin, cb, use_bottleneck, apply_bn):
        k = (cin, cb, use_bottleneck, apply_bn)
        if k not in fn_cache:
            fn_cache[k] = make_block_fn(B, L, cin, co, cb, use_bottleneck,
                                        apply_bn, bt, vmem_limit)
        return fn_cache[k]

    y = s = ss = None
    prev = None
    for i, blk in enumerate(blocks):
        use_bottleneck = "wb" in blk
        cin = h.shape[-1] if i == 0 else c_cat
        cb = blk["wb"].shape[1] if use_bottleneck else cin
        args = []
        if i == 0:
            args.append(h)
        else:
            # Fuse the previous block's BatchNorm + ReLU into this block's kernel;
            # only the tiny (1, C) scale/shift is computed here in XLA.
            scale, shift = _bn_affine(s, ss, prev["gamma"], prev["beta"], count)
            args += [y, scale, shift]
        if use_bottleneck:
            args.append(blk["wb"])
        args.append(blk["wf"])
        y, s, ss = get_block_fn(cin, cb, use_bottleneck, apply_bn=(i > 0))(*args)
        prev = blk

    # Last block's BN + ReLU + global average pool (Pallas); tiny FC in XLA.
    scale, shift = _bn_affine(s, ss, prev["gamma"], prev["beta"], count)
    pooled = make_head_fn(B, L, c_cat, bt, vmem_limit)(y, scale, shift)
    return pooled.reshape(B, c_cat) @ fc_w + fc_b


if __name__ == "__main__":
    # Small shapes consistent with the module: Conv1d input is (B, C_in, L).
    B, L = 2, 16
    in_channels, num_blocks, out_channels, num_classes = 6, 3, 32, 4

    key = jax.random.PRNGKey(0)
    x_ncl = jax.random.normal(jax.random.fold_in(key, 123), (B, in_channels, L), jnp.float32)

    raw_blocks, fc_w, fc_b = init_params(key, in_channels, num_blocks, out_channels, num_classes)
    params = prepare_params(raw_blocks, fc_w, fc_b)   # one-time weight fusion / bf16 casts

    fwd = jax.jit(inception_time_forward)
    logits = fwd(x_ncl, params)
    jax.block_until_ready(logits)

    assert logits.shape == (B, num_classes)
    assert bool(jnp.all(jnp.isfinite(logits)))
    print("KERNEL_OK")
</pallas_src>

<mosaic_0001>
module attributes {stable_mosaic.version = 11 : i64} {
  func.func @kernel(%arg0: i32, %arg1: memref<1x16x6xf32, #tpu.memory_space<vmem>>, %arg2: memref<6x32xbf16, #tpu.memory_space<vmem>>, %arg3: memref<1286x128xbf16, #tpu.memory_space<vmem>>, %arg4: memref<1x16x128xbf16, #tpu.memory_space<vmem>>, %arg5: memref<1x1x128xf32, #tpu.memory_space<vmem>>, %arg6: memref<1x1x128xf32, #tpu.memory_space<vmem>>) attributes {dimension_semantics = [#tpu.dimension_semantics<parallel>], iteration_bounds = array<i64: 2>, scalar_prefetch = 0 : i64, scratch_operands = 0 : i64, tpu.core_type = #tpu.core_type<tc>, window_params = [{transform_indices = @transform_0, window_bounds = array<i64: 1, 16, 6>}, {pipeline_mode = #tpu.pipeline_mode<synchronous>, transform_indices = @transform_1, window_bounds = array<i64: 6, 32>}, {pipeline_mode = #tpu.pipeline_mode<synchronous>, transform_indices = @transform_2, window_bounds = array<i64: 1286, 128>}, {transform_indices = @transform_3, window_bounds = array<i64: 1, 16, 128>}, {transform_indices = @transform_4, window_bounds = array<i64: 1, 1, 128>}, {transform_indices = @transform_5, window_bounds = array<i64: 1, 1, 128>}]} {
    %c0 = arith.constant 0 : index
    %c0_0 = arith.constant 0 : index
    %c0_1 = arith.constant 0 : index
    %0 = vector.load %arg1[%c0, %c0_0, %c0_1] : memref<1x16x6xf32, #tpu.memory_space<vmem>>, vector<1x16x6xf32>
    %1 = arith.truncf %0 : vector<1x16x6xf32> to vector<1x16x6xbf16>
    %2 = vector.shape_cast %1 : vector<1x16x6xbf16> to vector<16x6xbf16>
    %c0_2 = arith.constant 0 : index
    %c0_3 = arith.constant 0 : index
    %3 = vector.load %arg2[%c0_2, %c0_3] : memref<6x32xbf16, #tpu.memory_space<vmem>>, vector<6x32xbf16>
    %cst = arith.constant dense<0.000000e+00> : vector<16x32xf32>
    %4 = tpu.matmul %2, %3, %cst {dimension_numbers = #tpu.dot_dimension_numbers<[1], [0], [0], [1], [0, 0, 1, 1], [], []>} : vector<16x6xbf16>, vector<6x32xbf16>, vector<16x32xf32> -> vector<16x32xf32>
    %5 = arith.truncf %4 : vector<16x32xf32> to vector<16x32xbf16>
    %6 = vector.shape_cast %5 : vector<16x32xbf16> to vector<1x16x32xbf16>
    %c0_i32 = arith.constant 0 : i32
    %7 = arith.sitofp %c0_i32 : i32 to bf16
    %8 = vector.broadcast %7 : bf16 to vector<1x19x32xbf16>
    %9 = tpu.concatenate %8, %6 in 1 : vector<1x19x32xbf16>, vector<1x16x32xbf16> -> vector<1x35x32xbf16>
    %10 = vector.broadcast %7 : bf16 to vector<1x20x32xbf16>
    %11 = tpu.concatenate %9, %10 in 1 : vector<1x35x32xbf16>, vector<1x20x32xbf16> -> vector<1x55x32xbf16>
    %12 = arith.extf %1 : vector<1x16x6xbf16> to vector<1x16x6xf32>
    %cst_4 = arith.constant 0xFF800000 : f32
    %13 = vector.broadcast %cst_4 : f32 to vector<1x1x6xf32>
    %14 = tpu.concatenate %13, %12 in 1 : vector<1x1x6xf32>, vector<1x16x6xf32> -> vector<1x17x6xf32>
    %15 = vector.broadcast %cst_4 : f32 to vector<1x1x6xf32>
    %16 = tpu.concatenate %14, %15 in 1 : vector<1x17x6xf32>, vector<1x1x6xf32> -> vector<1x18x6xf32>
    %17 = vector.extract_strided_slice %16 {offsets = [0, 0, 0], sizes = [1, 16, 6], strides = [1, 1, 1]} : vector<1x18x6xf32> to vector<1x16x6xf32>
    %18 = vector.extract_strided_slice %16 {offsets = [0, 1, 0], sizes = [1, 16, 6], strides = [1, 1, 1]} : vector<1x18x6xf32> to vector<1x16x6xf32>
    %19 = arith.maximumf %17, %18 : vector<1x16x6xf32>
    %20 = vector.extract_strided_slice %16 {offsets = [0, 2, 0], sizes = [1, 16, 6], strides = [1, 1, 1]} : vector<1x18x6xf32> to vector<1x16x6xf32>
    %21 = arith.maximumf %19, %20 : vector<1x16x6xf32>
    %22 = arith.truncf %21 : vector<1x16x6xf32> to vector<1x16x6xbf16>
    %cst_5 = arith.constant 0.000000e+00 : f32
    %23 = vector.broadcast %cst_5 : f32 to vector<16x128xf32>
    %24 = vector.extract_strided_slice %11 {offsets = [0, 0, 0], sizes = [1, 16, 32], strides = [1, 1, 1]} : vector<1x55x32xbf16> to vector<1x16x32xbf16>
    %25 = vector.extract_strided_slice %11 {offsets = [0, 1, 0], sizes = [1, 16, 32], strides = [1, 1, 1]} : vector<1x55x32xbf16> to vector<1x16x32xbf16>
    %26 = vector.extract_strided_slice %11 {offsets = [0, 2, 0], sizes = [1, 16, 32], strides = [1, 1, 1]} : vector<1x55x32xbf16> to vector<1x16x32xbf16>
    %27 = vector.extract_strided_slice %11 {offsets = [0, 3, 0], sizes = [1, 16, 32], strides = [1, 1, 1]} : vector<1x55x32xbf16> to vector<1x16x32xbf16>
    %28 = tpu.concatenate %24, %25, %26, %27 in 2 : vector<1x16x32xbf16>, vector<1x16x32xbf16>, vector<1x16x32xbf16>, vector<1x16x32xbf16> -> vector<1x16x128xbf16>
    %29 = vector.shape_cast %28 : vector<1x16x128xbf16> to vector<16x128xbf16>
    %c0_6 = arith.constant 0 : index
    %c0_7 = arith.constant 0 : index
    %30 = vector.load %arg3[%c0_6, %c0_7] : memref<1286x128xbf16, #tpu.memory_space<vmem>>, vector<128x128xbf16>
    %cst_8 = arith.constant dense<0.000000e+00> : vector<16x128xf32>
    %31 = tpu.matmul %29, %30, %cst_8 {dimension_numbers = #tpu.dot_dimension_numbers<[1], [0], [0], [1], [0, 0, 1, 1], [], []>} : vector<16x128xbf16>, vector<128x128xbf16>, vector<16x128xf32> -> vector<16x128xf32>
    %32 = arith.addf %23, %31 : vector<16x128xf32>
    %33 = vector.extract_strided_slice %11 {offsets = [0, 4, 0], sizes = [1, 16, 32], strides = [1, 1, 1]} : vector<1x55x32xbf16> to vector<1x16x32xbf16>
    %34 = vector.extract_strided_slice %11 {offsets = [0, 5, 0], sizes = [1, 16, 32], strides = [1, 1, 1]} : vector<1x55x32xbf16> to vector<1x16x32xbf16>
    %35 = vector.extract_strided_slice %11 {offsets = [0, 6, 0], sizes = [1, 16, 32], strides = [1, 1, 1]} : vector<1x55x32xbf16> to vector<1x16x32xbf16>
    %36 = vector.extract_strided_slice %11 {offsets = [0, 7, 0], sizes = [1, 16, 32], strides = [1, 1, 1]} : vector<1x55x32xbf16> to vector<1x16x32xbf16>
    %37 = tpu.concatenate %33, %34, %35, %36 in 2 : vector<1x16x32xbf16>, vector<1x16x32xbf16>, vector<1x16x32xbf16>, vector<1x16x32xbf16> -> vector<1x16x128xbf16>
    %38 = vector.shape_cast %37 : vector<1x16x128xbf16> to vector<16x128xbf16>
    %c128 = arith.constant 128 : index
    %c0_9 = arith.constant 0 : index
    %39 = vector.load %arg3[%c128, %c0_9] : memref<1286x128xbf16, #tpu.memory_space<vmem>>, vector<128x128xbf16>
    %cst_10 = arith.constant dense<0.000000e+00> : vector<16x128xf32>
    %40 = tpu.matmul %38, %39, %cst_10 {dimension_numbers = #tpu.dot_dimension_numbers<[1], [0], [0], [1], [0, 0, 1, 1], [], []>} : vector<16x128xbf16>, vector<128x128xbf16>, vector<16x128xf32> -> vector<16x128xf32>
    %41 = arith.addf %32, %40 : vector<16x128xf32>
    %42 = vector.extract_strided_slice %11 {offsets = [0, 8, 0], sizes = [1, 16, 32], strides = [1, 1, 1]} : vector<1x55x32xbf16> to vector<1x16x32xbf16>
    %43 = vector.extract_strided_slice %11 {offsets = [0, 9, 0], sizes = [1, 16, 32], strides = [1, 1, 1]} : vector<1x55x32xbf16> to vector<1x16x32xbf16>
    %44 = vector.extract_strided_slice %11 {offsets = [0, 10, 0], sizes = [1, 16, 32], strides = [1, 1, 1]} : vector<1x55x32xbf16> to vector<1x16x32xbf16>
    %45 = vector.extract_strided_slice %11 {offsets = [0, 11, 0], sizes = [1, 16, 32], strides = [1, 1, 1]} : vector<1x55x32xbf16> to vector<1x16x32xbf16>
    %46 = tpu.concatenate %42, %43, %44, %45 in 2 : vector<1x16x32xbf16>, vector<1x16x32xbf16>, vector<1x16x32xbf16>, vector<1x16x32xbf16> -> vector<1x16x128xbf16>
    %47 = vector.shape_cast %46 : vector<1x16x128xbf16> to vector<16x128xbf16>
    %c256 = arith.constant 256 : index
    %c0_11 = arith.constant 0 : index
    %48 = vector.load %arg3[%c256, %c0_11] : memref<1286x128xbf16, #tpu.memory_space<vmem>>, vector<128x128xbf16>
    %cst_12 = arith.constant dense<0.000000e+00> : vector<16x128xf32>
    %49 = tpu.matmul %47, %48, %cst_12 {dimension_numbers = #tpu.dot_dimension_numbers<[1], [0], [0], [1], [0, 0, 1, 1], [], []>} : vector<16x128xbf16>, vector<128x128xbf16>, vector<16x128xf32> -> vector<16x128xf32>
    %50 = arith.addf %41, %49 : vector<16x128xf32>
    %51 = vector.extract_strided_slice %11 {offsets = [0, 12, 0], sizes = [1, 16, 32], strides = [1, 1, 1]} : vector<1x55x32xbf16> to vector<1x16x32xbf16>
    %52 = vector.extract_strided_slice %11 {offsets = [0, 13, 0], sizes = [1, 16, 32], strides = [1, 1, 1]} : vector<1x55x32xbf16> to vector<1x16x32xbf16>
    %53 = vector.extract_strided_slice %11 {offsets = [0, 14, 0], sizes = [1, 16, 32], strides = [1, 1, 1]} : vector<1x55x32xbf16> to vector<1x16x32xbf16>
    %54 = vector.extract_strided_slice %11 {offsets = [0, 15, 0], sizes = [1, 16, 32], strides = [1, 1, 1]} : vector<1x55x32xbf16> to vector<1x16x32xbf16>
    %55 = tpu.concatenate %51, %52, %53, %54 in 2 : vector<1x16x32xbf16>, vector<1x16x32xbf16>, vector<1x16x32xbf16>, vector<1x16x32xbf16> -> vector<1x16x128xbf16>
    %56 = vector.shape_cast %55 : vector<1x16x128xbf16> to vector<16x128xbf16>
    %c384 = arith.constant 384 : index
    %c0_13 = arith.constant 0 : index
    %57 = vector.load %arg3[%c384, %c0_13] : memref<1286x128xbf16, #tpu.memory_space<vmem>>, vector<128x128xbf16>
    %cst_14 = arith.constant dense<0.000000e+00> : vector<16x128xf32>
    %58 = tpu.matmul %56, %57, %cst_14 {dimension_numbers = #tpu.dot_dimension_numbers<[1], [0], [0], [1], [0, 0, 1, 1], [], []>} : vector<16x128xbf16>, vector<128x128xbf16>, vector<16x128xf32> -> vector<16x128xf32>
    %59 = arith.addf %50, %58 : vector<16x128xf32>
    %60 = vector.extract_strided_slice %11 {offsets = [0, 16, 0], sizes = [1, 16, 32], strides = [1, 1, 1]} : vector<1x55x32xbf16> to vector<1x16x32xbf16>
    %61 = vector.extract_strided_slice %11 {offsets = [0, 17, 0], sizes = [1, 16, 32], strides = [1, 1, 1]} : vector<1x55x32xbf16> to vector<1x16x32xbf16>
    %62 = vector.extract_strided_slice %11 {offsets = [0, 18, 0], sizes = [1, 16, 32], strides = [1, 1, 1]} : vector<1x55x32xbf16> to vector<1x16x32xbf16>
    %63 = vector.extract_strided_slice %11 {offsets = [0, 19, 0], sizes = [1, 16, 32], strides = [1, 1, 1]} : vector<1x55x32xbf16> to vector<1x16x32xbf16>
    %64 = tpu.concatenate %60, %61, %62, %63 in 2 : vector<1x16x32xbf16>, vector<1x16x32xbf16>, vector<1x16x32xbf16>, vector<1x16x32xbf16> -> vector<1x16x128xbf16>
    %65 = vector.shape_cast %64 : vector<1x16x128xbf16> to vector<16x128xbf16>
    %c512 = arith.constant 512 : index
    %c0_15 = arith.constant 0 : index
    %66 = vector.load %arg3[%c512, %c0_15] : memref<1286x128xbf16, #tpu.memory_space<vmem>>, vector<128x128xbf16>
    %cst_16 = arith.constant dense<0.000000e+00> : vector<16x128xf32>
    %67 = tpu.matmul %65, %66, %cst_16 {dimension_numbers = #tpu.dot_dimension_numbers<[1], [0], [0], [1], [0, 0, 1, 1], [], []>} : vector<16x128xbf16>, vector<128x128xbf16>, vector<16x128xf32> -> vector<16x128xf32>
    %68 = arith.addf %59, %67 : vector<16x128xf32>
    %69 = vector.extract_strided_slice %11 {offsets = [0, 20, 0], sizes = [1, 16, 32], strides = [1, 1, 1]} : vector<1x55x32xbf16> to vector<1x16x32xbf16>
    %70 = vector.extract_strided_slice %11 {offsets = [0, 21, 0], sizes = [1, 16, 32], strides = [1, 1, 1]} : vector<1x55x32xbf16> to vector<1x16x32xbf16>
    %71 = vector.extract_strided_slice %11 {offsets = [0, 22, 0], sizes = [1, 16, 32], strides = [1, 1, 1]} : vector<1x55x32xbf16> to vector<1x16x32xbf16>
    %72 = vector.extract_strided_slice %11 {offsets = [0, 23, 0], sizes = [1, 16, 32], strides = [1, 1, 1]} : vector<1x55x32xbf16> to vector<1x16x32xbf16>
    %73 = tpu.concatenate %69, %70, %71, %72 in 2 : vector<1x16x32xbf16>, vector<1x16x32xbf16>, vector<1x16x32xbf16>, vector<1x16x32xbf16> -> vector<1x16x128xbf16>
    %74 = vector.shape_cast %73 : vector<1x16x128xbf16> to vector<16x128xbf16>
    %c640 = arith.constant 640 : index
    %c0_17 = arith.constant 0 : index
    %75 = vector.load %arg3[%c640, %c0_17] : memref<1286x128xbf16, #tpu.memory_space<vmem>>, vector<128x128xbf16>
    %cst_18 = arith.constant dense<0.000000e+00> : vector<16x128xf32>
    %76 = tpu.matmul %74, %75, %cst_18 {dimension_numbers = #tpu.dot_dimension_numbers<[1], [0], [0], [1], [0, 0, 1, 1], [], []>} : vector<16x128xbf16>, vector<128x128xbf16>, vector<16x128xf32> -> vector<16x128xf32>
    %77 = arith.addf %68, %76 : vector<16x128xf32>
    %78 = vector.extract_strided_slice %11 {offsets = [0, 24, 0], sizes = [1, 16, 32], strides = [1, 1, 1]} : vector<1x55x32xbf16> to vector<1x16x32xbf16>
    %79 = vector.extract_strided_slice %11 {offsets = [0, 25, 0], sizes = [1, 16, 32], strides = [1, 1, 1]} : vector<1x55x32xbf16> to vector<1x16x32xbf16>
    %80 = vector.extract_strided_slice %11 {offsets = [0, 26, 0], sizes = [1, 16, 32], strides = [1, 1, 1]} : vector<1x55x32xbf16> to vector<1x16x32xbf16>
    %81 = vector.extract_strided_slice %11 {offsets = [0, 27, 0], sizes = [1, 16, 32], strides = [1, 1, 1]} : vector<1x55x32xbf16> to vector<1x16x32xbf16>
    %82 = tpu.concatenate %78, %79, %80, %81 in 2 : vector<1x16x32xbf16>, vector<1x16x32xbf16>, vector<1x16x32xbf16>, vector<1x16x32xbf16> -> vector<1x16x128xbf16>
    %83 = vector.shape_cast %82 : vector<1x16x128xbf16> to vector<16x128xbf16>
    %c768 = arith.constant 768 : index
    %c0_19 = arith.constant 0 : index
    %84 = vector.load %arg3[%c768, %c0_19] : memref<1286x128xbf16, #tpu.memory_space<vmem>>, vector<128x128xbf16>
    %cst_20 = arith.constant dense<0.000000e+00> : vector<16x128xf32>
    %85 = tpu.matmul %83, %84, %cst_20 {dimension_numbers = #tpu.dot_dimension_numbers<[1], [0], [0], [1], [0, 0, 1, 1], [], []>} : vector<16x128xbf16>, vector<128x128xbf16>, vector<16x128xf32> -> vector<16x128xf32>
    %86 = arith.addf %77, %85 : vector<16x128xf32>
    %87 = vector.extract_strided_slice %11 {offsets = [0, 28, 0], sizes = [1, 16, 32], strides = [1, 1, 1]} : vector<1x55x32xbf16> to vector<1x16x32xbf16>
    %88 = vector.extract_strided_slice %11 {offsets = [0, 29, 0], sizes = [1, 16, 32], strides = [1, 1, 1]} : vector<1x55x32xbf16> to vector<1x16x32xbf16>
    %89 = vector.extract_strided_slice %11 {offsets = [0, 30, 0], sizes = [1, 16, 32], strides = [1, 1, 1]} : vector<1x55x32xbf16> to vector<1x16x32xbf16>
    %90 = vector.extract_strided_slice %11 {offsets = [0, 31, 0], sizes = [1, 16, 32], strides = [1, 1, 1]} : vector<1x55x32xbf16> to vector<1x16x32xbf16>
    %91 = tpu.concatenate %87, %88, %89, %90 in 2 : vector<1x16x32xbf16>, vector<1x16x32xbf16>, vector<1x16x32xbf16>, vector<1x16x32xbf16> -> vector<1x16x128xbf16>
    %92 = vector.shape_cast %91 : vector<1x16x128xbf16> to vector<16x128xbf16>
    %c896 = arith.constant 896 : index
    %c0_21 = arith.constant 0 : index
    %93 = vector.load %arg3[%c896, %c0_21] : memref<1286x128xbf16, #tpu.memory_space<vmem>>, vector<128x128xbf16>
    %cst_22 = arith.constant dense<0.000000e+00> : vector<16x128xf32>
    %94 = tpu.matmul %92, %93, %cst_22 {dimension_numbers = #tpu.dot_dimension_numbers<[1], [0], [0], [1], [0, 0, 1, 1], [], []>} : vector<16x128xbf16>, vector<128x128xbf16>, vector<16x128xf32> -> vector<16x128xf32>
    %95 = arith.addf %86, %94 : vector<16x128xf32>
    %96 = vector.extract_strided_slice %11 {offsets = [0, 32, 0], sizes = [1, 16, 32], strides = [1, 1, 1]} : vector<1x55x32xbf16> to vector<1x16x32xbf16>
    %97 = vector.extract_strided_slice %11 {offsets = [0, 33, 0], sizes = [1, 16, 32], strides = [1, 1, 1]} : vector<1x55x32xbf16> to vector<1x16x32xbf16>
    %98 = vector.extract_strided_slice %11 {offsets = [0, 34, 0], sizes = [1, 16, 32], strides = [1, 1, 1]} : vector<1x55x32xbf16> to vector<1x16x32xbf16>
    %99 = vector.extract_strided_slice %11 {offsets = [0, 35, 0], sizes = [1, 16, 32], strides = [1, 1, 1]} : vector<1x55x32xbf16> to vector<1x16x32xbf16>
    %100 = tpu.concatenate %96, %97, %98, %99 in 2 : vector<1x16x32xbf16>, vector<1x16x32xbf16>, vector<1x16x32xbf16>, vector<1x16x32xbf16> -> vector<1x16x128xbf16>
    %101 = vector.shape_cast %100 : vector<1x16x128xbf16> to vector<16x128xbf16>
    %c1024 = arith.constant 1024 : index
    %c0_23 = arith.constant 0 : index
    %102 = vector.load %arg3[%c1024, %c0_23] : memref<1286x128xbf16, #tpu.memory_space<vmem>>, vector<128x128xbf16>
    %cst_24 = arith.constant dense<0.000000e+00> : vector<16x128xf32>
    %103 = tpu.matmul %101, %102, %cst_24 {dimension_numbers = #tpu.dot_dimension_numbers<[1], [0], [0], [1], [0, 0, 1, 1], [], []>} : vector<16x128xbf16>, vector<128x128xbf16>, vector<16x128xf32> -> vector<16x128xf32>
    %104 = arith.addf %95, %103 : vector<16x128xf32>
    %105 = vector.extract_strided_slice %11 {offsets = [0, 36, 0], sizes = [1, 16, 32], strides = [1, 1, 1]} : vector<1x55x32xbf16> to vector<1x16x32xbf16>
    %106 = vector.extract_strided_slice %11 {offsets = [0, 37, 0], sizes = [1, 16, 32], strides = [1, 1, 1]} : vector<1x55x32xbf16> to vector<1x16x32xbf16>
    %107 = vector.extract_strided_slice %11 {offsets = [0, 38, 0], sizes = [1, 16, 32], strides = [1, 1, 1]} : vector<1x55x32xbf16> to vector<1x16x32xbf16>
    %108 = vector.extract_strided_slice %11 {offsets = [0, 39, 0], sizes = [1, 16, 32], strides = [1, 1, 1]} : vector<1x55x32xbf16> to vector<1x16x32xbf16>
    %109 = tpu.concatenate %105, %106, %107, %108 in 2 : vector<1x16x32xbf16>, vector<1x16x32xbf16>, vector<1x16x32xbf16>, vector<1x16x32xbf16> -> vector<1x16x128xbf16>
    %110 = vector.shape_cast %109 : vector<1x16x128xbf16> to vector<16x128xbf16>
    %c1152 = arith.constant 1152 : index
    %c0_25 = arith.constant 0 : index
    %111 = vector.load %arg3[%c1152, %c0_25] : memref<1286x128xbf16, #tpu.memory_space<vmem>>, vector<128x128xbf16>
    %cst_26 = arith.constant dense<0.000000e+00> : vector<16x128xf32>
    %112 = tpu.matmul %110, %111, %cst_26 {dimension_numbers = #tpu.dot_dimension_numbers<[1], [0], [0], [1], [0, 0, 1, 1], [], []>} : vector<16x128xbf16>, vector<128x128xbf16>, vector<16x128xf32> -> vector<16x128xf32>
    %113 = arith.addf %104, %112 : vector<16x128xf32>
    %114 = vector.shape_cast %22 : vector<1x16x6xbf16> to vector<16x6xbf16>
    %c1280 = arith.constant 1280 : index
    %c0_27 = arith.constant 0 : index
    %115 = vector.load %arg3[%c1280, %c0_27] : memref<1286x128xbf16, #tpu.memory_space<vmem>>, vector<6x128xbf16>
    %cst_28 = arith.constant dense<0.000000e+00> : vector<16x128xf32>
    %116 = tpu.matmul %114, %115, %cst_28 {dimension_numbers = #tpu.dot_dimension_numbers<[1], [0], [0], [1], [0, 0, 1, 1], [], []>} : vector<16x6xbf16>, vector<6x128xbf16>, vector<16x128xf32> -> vector<16x128xf32>
    %117 = arith.addf %113, %116 : vector<16x128xf32>
    %cst_29 = arith.constant dense<0.000000e+00> : vector<128xf32>
    %118 = vector.multi_reduction <add>, %117, %cst_29 [0] : vector<16x128xf32> to vector<128xf32>
    %119 = vector.shape_cast %118 : vector<128xf32> to vector<1x128xf32>
    %c0_30 = arith.constant 0 : index
    %c0_31 = arith.constant 0 : index
    %c0_32 = arith.constant 0 : index
    %120 = vector.load %arg5[%c0_30, %c0_31, %c0_32] : memref<1x1x128xf32, #tpu.memory_space<vmem>>, vector<1x1x128xf32>
    %121 = vector.shape_cast %120 : vector<1x1x128xf32> to vector<1x128xf32>
    %122 = vector.shape_cast %119 : vector<1x128xf32> to vector<1x1x128xf32>
    tpu.vector_store %arg5[%c0_30, %c0_31, %c0_32], %122 {strides = array<i32>} : memref<1x1x128xf32, #tpu.memory_space<vmem>>, vector<1x1x128xf32>,
    %123 = arith.mulf %117, %117 : vector<16x128xf32>
    %cst_33 = arith.constant dense<0.000000e+00> : vector<128xf32>
    %124 = vector.multi_reduction <add>, %123, %cst_33 [0] : vector<16x128xf32> to vector<128xf32>
    %125 = vector.shape_cast %124 : vector<128xf32> to vector<1x128xf32>
    %c0_34 = arith.constant 0 : index
    %c0_35 = arith.constant 0 : index
    %c0_36 = arith.constant 0 : index
    %126 = vector.load %arg6[%c0_34, %c0_35, %c0_36] : memref<1x1x128xf32, #tpu.memory_space<vmem>>, vector<1x1x128xf32>
    %127 = vector.shape_cast %126 : vector<1x1x128xf32> to vector<1x128xf32>
    %128 = vector.shape_cast %125 : vector<1x128xf32> to vector<1x1x128xf32>
    tpu.vector_store %arg6[%c0_34, %c0_35, %c0_36], %128 {strides = array<i32>} : memref<1x1x128xf32, #tpu.memory_space<vmem>>, vector<1x1x128xf32>,
    %129 = vector.shape_cast %117 : vector<16x128xf32> to vector<1x16x128xf32>
    %130 = arith.truncf %129 : vector<1x16x128xf32> to vector<1x16x128xbf16>
    %c0_37 = arith.constant 0 : index
    %c0_38 = arith.constant 0 : index
    %c0_39 = arith.constant 0 : index
    %131 = vector.load %arg4[%c0_37, %c0_38, %c0_39] : memref<1x16x128xbf16, #tpu.memory_space<vmem>>, vector<1x16x128xbf16>
    tpu.vector_store %arg4[%c0_37, %c0_38, %c0_39], %130 {strides = array<i32>} : memref<1x16x128xbf16, #tpu.memory_space<vmem>>, vector<1x16x128xbf16>,
    return
  }
  func.func @transform_0(%arg0: i32) -> (i32, i32, i32) {
    %c0_i32 = arith.constant 0 : i32
    %c0_i32_0 = arith.constant 0 : i32
    %c0_i32_1 = arith.constant 0 : i32
    return %arg0, %c0_i32, %c0_i32_0 : i32, i32, i32
  }
  func.func @transform_1(%arg0: i32) -> (i32, i32) {
    %c0_i32 = arith.constant 0 : i32
    %c0_i32_0 = arith.constant 0 : i32
    %c0_i32_1 = arith.constant 0 : i32
    return %c0_i32, %c0_i32_0 : i32, i32
  }
  func.func @transform_2(%arg0: i32) -> (i32, i32) {
    %c0_i32 = arith.constant 0 : i32
    %c0_i32_0 = arith.constant 0 : i32
    %c0_i32_1 = arith.constant 0 : i32
    return %c0_i32, %c0_i32_0 : i32, i32
  }
  func.func @transform_3(%arg0: i32) -> (i32, i32, i32) {
    %c0_i32 = arith.constant 0 : i32
    %c0_i32_0 = arith.constant 0 : i32
    %c0_i32_1 = arith.constant 0 : i32
    return %arg0, %c0_i32, %c0_i32_0 : i32, i32, i32
  }
  func.func @transform_4(%arg0: i32) -> (i32, i32, i32) {
    %c0_i32 = arith.constant 0 : i32
    %c0_i32_0 = arith.constant 0 : i32
    %c0_i32_1 = arith.constant 0 : i32
    return %arg0, %c0_i32, %c0_i32_0 : i32, i32, i32
  }
  func.func @transform_5(%arg0: i32) -> (i32, i32, i32) {
    %c0_i32 = arith.constant 0 : i32
    %c0_i32_0 = arith.constant 0 : i32
    %c0_i32_1 = arith.constant 0 : i32
    return %arg0, %c0_i32, %c0_i32_0 : i32, i32, i32
  }
}

module attributes {stable_mosaic.version = 11 : i64} {
  func.func @kernel(%arg0: i32, %arg1: memref<1x16x128xbf16, #tpu.memory_space<vmem>>, %arg2: memref<1x128xf32, #tpu.memory_space<vmem>>, %arg3: memref<1x128xf32, #tpu.memory_space<vmem>>, %arg4: memref<1x1x128xf32, #tpu.memory_space<vmem>>) attributes {dimension_semantics = [#tpu.dimension_semantics<parallel>], iteration_bounds = array<i64: 2>, scalar_prefetch = 0 : i64, scratch_operands = 0 : i64, tpu.core_type = #tpu.core_type<tc>, window_params = [{transform_indices = @transform_0, window_bounds = array<i64: 1, 16, 128>}, {pipeline_mode = #tpu.pipeline_mode<synchronous>, transform_indices = @transform_1, window_bounds = array<i64: 1, 128>}, {pipeline_mode = #tpu.pipeline_mode<synchronous>, transform_indices = @transform_2, window_bounds = array<i64: 1, 128>}, {transform_indices = @transform_3, window_bounds = array<i64: 1, 1, 128>}]} {
    %c0 = arith.constant 0 : index
    %c0_0 = arith.constant 0 : index
    %c0_1 = arith.constant 0 : index
    %0 = vector.load %arg1[%c0, %c0_0, %c0_1] : memref<1x16x128xbf16, #tpu.memory_space<vmem>>, vector<1x16x128xbf16>
    %1 = arith.extf %0 : vector<1x16x128xbf16> to vector<1x16x128xf32>
    %c0_2 = arith.constant 0 : index
    %c0_3 = arith.constant 0 : index
    %2 = vector.load %arg2[%c0_2, %c0_3] : memref<1x128xf32, #tpu.memory_space<vmem>>, vector<1x128xf32>
    %3 = vector.shape_cast %2 : vector<1x128xf32> to vector<1x1x128xf32>
    %4 = vector.broadcast %3 : vector<1x1x128xf32> to vector<1x16x128xf32>
    %5 = arith.mulf %1, %4 : vector<1x16x128xf32>
    %c0_4 = arith.constant 0 : index
    %c0_5 = arith.constant 0 : index
    %6 = vector.load %arg3[%c0_4, %c0_5] : memref<1x128xf32, #tpu.memory_space<vmem>>, vector<1x128xf32>
    %7 = vector.shape_cast %6 : vector<1x128xf32> to vector<1x1x128xf32>
    %8 = vector.broadcast %7 : vector<1x1x128xf32> to vector<1x16x128xf32>
    %9 = arith.addf %5, %8 : vector<1x16x128xf32>
    %cst = arith.constant 0.000000e+00 : f32
    %10 = vector.broadcast %cst : f32 to vector<1x16x128xf32>
    %11 = arith.maximumf %9, %10 : vector<1x16x128xf32>
    %cst_6 = arith.constant dense<0.000000e+00> : vector<1x128xf32>
    %12 = vector.multi_reduction <add>, %11, %cst_6 [1] : vector<1x16x128xf32> to vector<1x128xf32>
    %13 = vector.shape_cast %12 : vector<1x128xf32> to vector<1x1x128xf32>
    %cst_7 = arith.constant 6.250000e-02 : f32
    %14 = vector.broadcast %cst_7 : f32 to vector<1x1x128xf32>
    %15 = arith.mulf %13, %14 : vector<1x1x128xf32>
    %c0_8 = arith.constant 0 : index
    %c0_9 = arith.constant 0 : index
    %c0_10 = arith.constant 0 : index
    %16 = vector.load %arg4[%c0_8, %c0_9, %c0_10] : memref<1x1x128xf32, #tpu.memory_space<vmem>>, vector<1x1x128xf32>
    tpu.vector_store %arg4[%c0_8, %c0_9, %c0_10], %15 {strides = array<i32>} : memref<1x1x128xf32, #tpu.memory_space<vmem>>, vector<1x1x128xf32>,
    return
  }
  func.func @transform_0(%arg0: i32) -> (i32, i32, i32) {
    %c0_i32 = arith.constant 0 : i32
    %c0_i32_0 = arith.constant 0 : i32
    %c0_i32_1 = arith.constant 0 : i32
    return %arg0, %c0_i32, %c0_i32_0 : i32, i32, i32
  }
  func.func @transform_1(%arg0: i32) -> (i32, i32) {
    %c0_i32 = arith.constant 0 : i32
    %c0_i32_0 = arith.constant 0 : i32
    %c0_i32_1 = arith.constant 0 : i32
    return %c0_i32, %c0_i32_0 : i32, i32
  }
  func.func @transform_2(%arg0: i32) -> (i32, i32) {
    %c0_i32 = arith.constant 0 : i32
    %c0_i32_0 = arith.constant 0 : i32
    %c0_i32_1 = arith.constant 0 : i32
    return %c0_i32, %c0_i32_0 : i32, i32
  }
  func.func @transform_3(%arg0: i32) -> (i32, i32, i32) {
    %c0_i32 = arith.constant 0 : i32
    %c0_i32_0 = arith.constant 0 : i32
    %c0_i32_1 = arith.constant 0 : i32
    return %arg0, %c0_i32, %c0_i32_0 : i32, i32, i32
  }
}

module attributes {stable_mosaic.version = 11 : i64} {
  func.func @kernel(%arg0: i32, %arg1: memref<1x16x128xbf16, #tpu.memory_space<vmem>>, %arg2: memref<1x128xf32, #tpu.memory_space<vmem>>, %arg3: memref<1x128xf32, #tpu.memory_space<vmem>>, %arg4: memref<128x32xbf16, #tpu.memory_space<vmem>>, %arg5: memref<1408x128xbf16, #tpu.memory_space<vmem>>, %arg6: memref<1x16x128xbf16, #tpu.memory_space<vmem>>, %arg7: memref<1x1x128xf32, #tpu.memory_space<vmem>>, %arg8: memref<1x1x128xf32, #tpu.memory_space<vmem>>) attributes {dimension_semantics = [#tpu.dimension_semantics<parallel>], iteration_bounds = array<i64: 2>, scalar_prefetch = 0 : i64, scratch_operands = 0 : i64, tpu.core_type = #tpu.core_type<tc>, window_params = [{transform_indices = @transform_0, window_bounds = array<i64: 1, 16, 128>}, {pipeline_mode = #tpu.pipeline_mode<synchronous>, transform_indices = @transform_1, window_bounds = array<i64: 1, 128>}, {pipeline_mode = #tpu.pipeline_mode<synchronous>, transform_indices = @transform_2, window_bounds = array<i64: 1, 128>}, {pipeline_mode = #tpu.pipeline_mode<synchronous>, transform_indices = @transform_3, window_bounds = array<i64: 128, 32>}, {pipeline_mode = #tpu.pipeline_mode<synchronous>, transform_indices = @transform_4, window_bounds = array<i64: 1408, 128>}, {transform_indices = @transform_5, window_bounds = array<i64: 1, 16, 128>}, {transform_indices = @transform_6, window_bounds = array<i64: 1, 1, 128>}, {transform_indices = @transform_7, window_bounds = array<i64: 1, 1, 128>}]} {
    %c0 = arith.constant 0 : index
    %c0_0 = arith.constant 0 : index
    %c0_1 = arith.constant 0 : index
    %0 = vector.load %arg1[%c0, %c0_0, %c0_1] : memref<1x16x128xbf16, #tpu.memory_space<vmem>>, vector<1x16x128xbf16>
    %1 = arith.extf %0 : vector<1x16x128xbf16> to vector<1x16x128xf32>
    %c0_2 = arith.constant 0 : index
    %c0_3 = arith.constant 0 : index
    %2 = vector.load %arg2[%c0_2, %c0_3] : memref<1x128xf32, #tpu.memory_space<vmem>>, vector<1x128xf32>
    %3 = vector.shape_cast %2 : vector<1x128xf32> to vector<1x1x128xf32>
    %4 = vector.broadcast %3 : vector<1x1x128xf32> to vector<1x16x128xf32>
    %5 = arith.mulf %1, %4 : vector<1x16x128xf32>
    %c0_4 = arith.constant 0 : index
    %c0_5 = arith.constant 0 : index
    %6 = vector.load %arg3[%c0_4, %c0_5] : memref<1x128xf32, #tpu.memory_space<vmem>>, vector<1x128xf32>
    %7 = vector.shape_cast %6 : vector<1x128xf32> to vector<1x1x128xf32>
    %8 = vector.broadcast %7 : vector<1x1x128xf32> to vector<1x16x128xf32>
    %9 = arith.addf %5, %8 : vector<1x16x128xf32>
    %cst = arith.constant 0.000000e+00 : f32
    %10 = vector.broadcast %cst : f32 to vector<1x16x128xf32>
    %11 = arith.maximumf %9, %10 : vector<1x16x128xf32>
    %12 = arith.truncf %11 : vector<1x16x128xf32> to vector<1x16x128xbf16>
    %13 = vector.shape_cast %12 : vector<1x16x128xbf16> to vector<16x128xbf16>
    %c0_6 = arith.constant 0 : index
    %c0_7 = arith.constant 0 : index
    %14 = vector.load %arg4[%c0_6, %c0_7] : memref<128x32xbf16, #tpu.memory_space<vmem>>, vector<128x32xbf16>
    %cst_8 = arith.constant dense<0.000000e+00> : vector<16x32xf32>
    %15 = tpu.matmul %13, %14, %cst_8 {dimension_numbers = #tpu.dot_dimension_numbers<[1], [0], [0], [1], [0, 0, 1, 1], [], []>} : vector<16x128xbf16>, vector<128x32xbf16>, vector<16x32xf32> -> vector<16x32xf32>
    %16 = arith.truncf %15 : vector<16x32xf32> to vector<16x32xbf16>
    %17 = vector.shape_cast %16 : vector<16x32xbf16> to vector<1x16x32xbf16>
    %c0_i32 = arith.constant 0 : i32
    %18 = arith.sitofp %c0_i32 : i32 to bf16
    %19 = vector.broadcast %18 : bf16 to vector<1x19x32xbf16>
    %20 = tpu.concatenate %19, %17 in 1 : vector<1x19x32xbf16>, vector<1x16x32xbf16> -> vector<1x35x32xbf16>
    %21 = vector.broadcast %18 : bf16 to vector<1x20x32xbf16>
    %22 = tpu.concatenate %20, %21 in 1 : vector<1x35x32xbf16>, vector<1x20x32xbf16> -> vector<1x55x32xbf16>
    %23 = arith.extf %12 : vector<1x16x128xbf16> to vector<1x16x128xf32>
    %cst_9 = arith.constant 0xFF800000 : f32
    %24 = vector.broadcast %cst_9 : f32 to vector<1x1x128xf32>
    %25 = tpu.concatenate %24, %23 in 1 : vector<1x1x128xf32>, vector<1x16x128xf32> -> vector<1x17x128xf32>
    %26 = vector.broadcast %cst_9 : f32 to vector<1x1x128xf32>
    %27 = tpu.concatenate %25, %26 in 1 : vector<1x17x128xf32>, vector<1x1x128xf32> -> vector<1x18x128xf32>
    %28 = vector.extract_strided_slice %27 {offsets = [0, 0, 0], sizes = [1, 16, 128], strides = [1, 1, 1]} : vector<1x18x128xf32> to vector<1x16x128xf32>
    %29 = vector.extract_strided_slice %27 {offsets = [0, 1, 0], sizes = [1, 16, 128], strides = [1, 1, 1]} : vector<1x18x128xf32> to vector<1x16x128xf32>
    %30 = arith.maximumf %28, %29 : vector<1x16x128xf32>
    %31 = vector.extract_strided_slice %27 {offsets = [0, 2, 0], sizes = [1, 16, 128], strides = [1, 1, 1]} : vector<1x18x128xf32> to vector<1x16x128xf32>
    %32 = arith.maximumf %30, %31 : vector<1x16x128xf32>
    %33 = arith.truncf %32 : vector<1x16x128xf32> to vector<1x16x128xbf16>
    %cst_10 = arith.constant 0.000000e+00 : f32
    %34 = vector.broadcast %cst_10 : f32 to vector<16x128xf32>
    %35 = vector.extract_strided_slice %22 {offsets = [0, 0, 0], sizes = [1, 16, 32], strides = [1, 1, 1]} : vector<1x55x32xbf16> to vector<1x16x32xbf16>
    %36 = vector.extract_strided_slice %22 {offsets = [0, 1, 0], sizes = [1, 16, 32], strides = [1, 1, 1]} : vector<1x55x32xbf16> to vector<1x16x32xbf16>
    %37 = vector.extract_strided_slice %22 {offsets = [0, 2, 0], sizes = [1, 16, 32], strides = [1, 1, 1]} : vector<1x55x32xbf16> to vector<1x16x32xbf16>
    %38 = vector.extract_strided_slice %22 {offsets = [0, 3, 0], sizes = [1, 16, 32], strides = [1, 1, 1]} : vector<1x55x32xbf16> to vector<1x16x32xbf16>
    %39 = tpu.concatenate %35, %36, %37, %38 in 2 : vector<1x16x32xbf16>, vector<1x16x32xbf16>, vector<1x16x32xbf16>, vector<1x16x32xbf16> -> vector<1x16x128xbf16>
    %40 = vector.shape_cast %39 : vector<1x16x128xbf16> to vector<16x128xbf16>
    %c0_11 = arith.constant 0 : index
    %c0_12 = arith.constant 0 : index
    %41 = vector.load %arg5[%c0_11, %c0_12] : memref<1408x128xbf16, #tpu.memory_space<vmem>>, vector<128x128xbf16>
    %cst_13 = arith.constant dense<0.000000e+00> : vector<16x128xf32>
    %42 = tpu.matmul %40, %41, %cst_13 {dimension_numbers = #tpu.dot_dimension_numbers<[1], [0], [0], [1], [0, 0, 1, 1], [], []>} : vector<16x128xbf16>, vector<128x128xbf16>, vector<16x128xf32> -> vector<16x128xf32>
    %43 = arith.addf %34, %42 : vector<16x128xf32>
    %44 = vector.extract_strided_slice %22 {offsets = [0, 4, 0], sizes = [1, 16, 32], strides = [1, 1, 1]} : vector<1x55x32xbf16> to vector<1x16x32xbf16>
    %45 = vector.extract_strided_slice %22 {offsets = [0, 5, 0], sizes = [1, 16, 32], strides = [1, 1, 1]} : vector<1x55x32xbf16> to vector<1x16x32xbf16>
    %46 = vector.extract_strided_slice %22 {offsets = [0, 6, 0], sizes = [1, 16, 32], strides = [1, 1, 1]} : vector<1x55x32xbf16> to vector<1x16x32xbf16>
    %47 = vector.extract_strided_slice %22 {offsets = [0, 7, 0], sizes = [1, 16, 32], strides = [1, 1, 1]} : vector<1x55x32xbf16> to vector<1x16x32xbf16>
    %48 = tpu.concatenate %44, %45, %46, %47 in 2 : vector<1x16x32xbf16>, vector<1x16x32xbf16>, vector<1x16x32xbf16>, vector<1x16x32xbf16> -> vector<1x16x128xbf16>
    %49 = vector.shape_cast %48 : vector<1x16x128xbf16> to vector<16x128xbf16>
    %c128 = arith.constant 128 : index
    %c0_14 = arith.constant 0 : index
    %50 = vector.load %arg5[%c128, %c0_14] : memref<1408x128xbf16, #tpu.memory_space<vmem>>, vector<128x128xbf16>
    %cst_15 = arith.constant dense<0.000000e+00> : vector<16x128xf32>
    %51 = tpu.matmul %49, %50, %cst_15 {dimension_numbers = #tpu.dot_dimension_numbers<[1], [0], [0], [1], [0, 0, 1, 1], [], []>} : vector<16x128xbf16>, vector<128x128xbf16>, vector<16x128xf32> -> vector<16x128xf32>
    %52 = arith.addf %43, %51 : vector<16x128xf32>
    %53 = vector.extract_strided_slice %22 {offsets = [0, 8, 0], sizes = [1, 16, 32], strides = [1, 1, 1]} : vector<1x55x32xbf16> to vector<1x16x32xbf16>
    %54 = vector.extract_strided_slice %22 {offsets = [0, 9, 0], sizes = [1, 16, 32], strides = [1, 1, 1]} : vector<1x55x32xbf16> to vector<1x16x32xbf16>
    %55 = vector.extract_strided_slice %22 {offsets = [0, 10, 0], sizes = [1, 16, 32], strides = [1, 1, 1]} : vector<1x55x32xbf16> to vector<1x16x32xbf16>
    %56 = vector.extract_strided_slice %22 {offsets = [0, 11, 0], sizes = [1, 16, 32], strides = [1, 1, 1]} : vector<1x55x32xbf16> to vector<1x16x32xbf16>
    %57 = tpu.concatenate %53, %54, %55, %56 in 2 : vector<1x16x32xbf16>, vector<1x16x32xbf16>, vector<1x16x32xbf16>, vector<1x16x32xbf16> -> vector<1x16x128xbf16>
    %58 = vector.shape_cast %57 : vector<1x16x128xbf16> to vector<16x128xbf16>
    %c256 = arith.constant 256 : index
    %c0_16 = arith.constant 0 : index
    %59 = vector.load %arg5[%c256, %c0_16] : memref<1408x128xbf16, #tpu.memory_space<vmem>>, vector<128x128xbf16>
    %cst_17 = arith.constant dense<0.000000e+00> : vector<16x128xf32>
    %60 = tpu.matmul %58, %59, %cst_17 {dimension_numbers = #tpu.dot_dimension_numbers<[1], [0], [0], [1], [0, 0, 1, 1], [], []>} : vector<16x128xbf16>, vector<128x128xbf16>, vector<16x128xf32> -> vector<16x128xf32>
    %61 = arith.addf %52, %60 : vector<16x128xf32>
    %62 = vector.extract_strided_slice %22 {offsets = [0, 12, 0], sizes = [1, 16, 32], strides = [1, 1, 1]} : vector<1x55x32xbf16> to vector<1x16x32xbf16>
    %63 = vector.extract_strided_slice %22 {offsets = [0, 13, 0], sizes = [1, 16, 32], strides = [1, 1, 1]} : vector<1x55x32xbf16> to vector<1x16x32xbf16>
    %64 = vector.extract_strided_slice %22 {offsets = [0, 14, 0], sizes = [1, 16, 32], strides = [1, 1, 1]} : vector<1x55x32xbf16> to vector<1x16x32xbf16>
    %65 = vector.extract_strided_slice %22 {offsets = [0, 15, 0], sizes = [1, 16, 32], strides = [1, 1, 1]} : vector<1x55x32xbf16> to vector<1x16x32xbf16>
    %66 = tpu.concatenate %62, %63, %64, %65 in 2 : vector<1x16x32xbf16>, vector<1x16x32xbf16>, vector<1x16x32xbf16>, vector<1x16x32xbf16> -> vector<1x16x128xbf16>
    %67 = vector.shape_cast %66 : vector<1x16x128xbf16> to vector<16x128xbf16>
    %c384 = arith.constant 384 : index
    %c0_18 = arith.constant 0 : index
    %68 = vector.load %arg5[%c384, %c0_18] : memref<1408x128xbf16, #tpu.memory_space<vmem>>, vector<128x128xbf16>
    %cst_19 = arith.constant dense<0.000000e+00> : vector<16x128xf32>
    %69 = tpu.matmul %67, %68, %cst_19 {dimension_numbers = #tpu.dot_dimension_numbers<[1], [0], [0], [1], [0, 0, 1, 1], [], []>} : vector<16x128xbf16>, vector<128x128xbf16>, vector<16x128xf32> -> vector<16x128xf32>
    %70 = arith.addf %61, %69 : vector<16x128xf32>
    %71 = vector.extract_strided_slice %22 {offsets = [0, 16, 0], sizes = [1, 16, 32], strides = [1, 1, 1]} : vector<1x55x32xbf16> to vector<1x16x32xbf16>
    %72 = vector.extract_strided_slice %22 {offsets = [0, 17, 0], sizes = [1, 16, 32], strides = [1, 1, 1]} : vector<1x55x32xbf16> to vector<1x16x32xbf16>
    %73 = vector.extract_strided_slice %22 {offsets = [0, 18, 0], sizes = [1, 16, 32], strides = [1, 1, 1]} : vector<1x55x32xbf16> to vector<1x16x32xbf16>
    %74 = vector.extract_strided_slice %22 {offsets = [0, 19, 0], sizes = [1, 16, 32], strides = [1, 1, 1]} : vector<1x55x32xbf16> to vector<1x16x32xbf16>
    %75 = tpu.concatenate %71, %72, %73, %74 in 2 : vector<1x16x32xbf16>, vector<1x16x32xbf16>, vector<1x16x32xbf16>, vector<1x16x32xbf16> -> vector<1x16x128xbf16>
    %76 = vector.shape_cast %75 : vector<1x16x128xbf16> to vector<16x128xbf16>
    %c512 = arith.constant 512 : index
    %c0_20 = arith.constant 0 : index
    %77 = vector.load %arg5[%c512, %c0_20] : memref<1408x128xbf16, #tpu.memory_space<vmem>>, vector<128x128xbf16>
    %cst_21 = arith.constant dense<0.000000e+00> : vector<16x128xf32>
    %78 = tpu.matmul %76, %77, %cst_21 {dimension_numbers = #tpu.dot_dimension_numbers<[1], [0], [0], [1], [0, 0, 1, 1], [], []>} : vector<16x128xbf16>, vector<128x128xbf16>, vector<16x128xf32> -> vector<16x128xf32>
    %79 = arith.addf %70, %78 : vector<16x128xf32>
    %80 = vector.extract_strided_slice %22 {offsets = [0, 20, 0], sizes = [1, 16, 32], strides = [1, 1, 1]} : vector<1x55x32xbf16> to vector<1x16x32xbf16>
    %81 = vector.extract_strided_slice %22 {offsets = [0, 21, 0], sizes = [1, 16, 32], strides = [1, 1, 1]} : vector<1x55x32xbf16> to vector<1x16x32xbf16>
    %82 = vector.extract_strided_slice %22 {offsets = [0, 22, 0], sizes = [1, 16, 32], strides = [1, 1, 1]} : vector<1x55x32xbf16> to vector<1x16x32xbf16>
    %83 = vector.extract_strided_slice %22 {offsets = [0, 23, 0], sizes = [1, 16, 32], strides = [1, 1, 1]} : vector<1x55x32xbf16> to vector<1x16x32xbf16>
    %84 = tpu.concatenate %80, %81, %82, %83 in 2 : vector<1x16x32xbf16>, vector<1x16x32xbf16>, vector<1x16x32xbf16>, vector<1x16x32xbf16> -> vector<1x16x128xbf16>
    %85 = vector.shape_cast %84 : vector<1x16x128xbf16> to vector<16x128xbf16>
    %c640 = arith.constant 640 : index
    %c0_22 = arith.constant 0 : index
    %86 = vector.load %arg5[%c640, %c0_22] : memref<1408x128xbf16, #tpu.memory_space<vmem>>, vector<128x128xbf16>
    %cst_23 = arith.constant dense<0.000000e+00> : vector<16x128xf32>
    %87 = tpu.matmul %85, %86, %cst_23 {dimension_numbers = #tpu.dot_dimension_numbers<[1], [0], [0], [1], [0, 0, 1, 1], [], []>} : vector<16x128xbf16>, vector<128x128xbf16>, vector<16x128xf32> -> vector<16x128xf32>
    %88 = arith.addf %79, %87 : vector<16x128xf32>
    %89 = vector.extract_strided_slice %22 {offsets = [0, 24, 0], sizes = [1, 16, 32], strides = [1, 1, 1]} : vector<1x55x32xbf16> to vector<1x16x32xbf16>
    %90 = vector.extract_strided_slice %22 {offsets = [0, 25, 0], sizes = [1, 16, 32], strides = [1, 1, 1]} : vector<1x55x32xbf16> to vector<1x16x32xbf16>
    %91 = vector.extract_strided_slice %22 {offsets = [0, 26, 0], sizes = [1, 16, 32], strides = [1, 1, 1]} : vector<1x55x32xbf16> to vector<1x16x32xbf16>
    %92 = vector.extract_strided_slice %22 {offsets = [0, 27, 0], sizes = [1, 16, 32], strides = [1, 1, 1]} : vector<1x55x32xbf16> to vector<1x16x32xbf16>
    %93 = tpu.concatenate %89, %90, %91, %92 in 2 : vector<1x16x32xbf16>, vector<1x16x32xbf16>, vector<1x16x32xbf16>, vector<1x16x32xbf16> -> vector<1x16x128xbf16>
    %94 = vector.shape_cast %93 : vector<1x16x128xbf16> to vector<16x128xbf16>
    %c768 = arith.constant 768 : index
    %c0_24 = arith.constant 0 : index
    %95 = vector.load %arg5[%c768, %c0_24] : memref<1408x128xbf16, #tpu.memory_space<vmem>>, vector<128x128xbf16>
    %cst_25 = arith.constant dense<0.000000e+00> : vector<16x128xf32>
    %96 = tpu.matmul %94, %95, %cst_25 {dimension_numbers = #tpu.dot_dimension_numbers<[1], [0], [0], [1], [0, 0, 1, 1], [], []>} : vector<16x128xbf16>, vector<128x128xbf16>, vector<16x128xf32> -> vector<16x128xf32>
    %97 = arith.addf %88, %96 : vector<16x128xf32>
    %98 = vector.extract_strided_slice %22 {offsets = [0, 28, 0], sizes = [1, 16, 32], strides = [1, 1, 1]} : vector<1x55x32xbf16> to vector<1x16x32xbf16>
    %99 = vector.extract_strided_slice %22 {offsets = [0, 29, 0], sizes = [1, 16, 32], strides = [1, 1, 1]} : vector<1x55x32xbf16> to vector<1x16x32xbf16>
    %100 = vector.extract_strided_slice %22 {offsets = [0, 30, 0], sizes = [1, 16, 32], strides = [1, 1, 1]} : vector<1x55x32xbf16> to vector<1x16x32xbf16>
    %101 = vector.extract_strided_slice %22 {offsets = [0, 31, 0], sizes = [1, 16, 32], strides = [1, 1, 1]} : vector<1x55x32xbf16> to vector<1x16x32xbf16>
    %102 = tpu.concatenate %98, %99, %100, %101 in 2 : vector<1x16x32xbf16>, vector<1x16x32xbf16>, vector<1x16x32xbf16>, vector<1x16x32xbf16> -> vector<1x16x128xbf16>
    %103 = vector.shape_cast %102 : vector<1x16x128xbf16> to vector<16x128xbf16>
    %c896 = arith.constant 896 : index
    %c0_26 = arith.constant 0 : index
    %104 = vector.load %arg5[%c896, %c0_26] : memref<1408x128xbf16, #tpu.memory_space<vmem>>, vector<128x128xbf16>
    %cst_27 = arith.constant dense<0.000000e+00> : vector<16x128xf32>
    %105 = tpu.matmul %103, %104, %cst_27 {dimension_numbers = #tpu.dot_dimension_numbers<[1], [0], [0], [1], [0, 0, 1, 1], [], []>} : vector<16x128xbf16>, vector<128x128xbf16>, vector<16x128xf32> -> vector<16x128xf32>
    %106 = arith.addf %97, %105 : vector<16x128xf32>
    %107 = vector.extract_strided_slice %22 {offsets = [0, 32, 0], sizes = [1, 16, 32], strides = [1, 1, 1]} : vector<1x55x32xbf16> to vector<1x16x32xbf16>
    %108 = vector.extract_strided_slice %22 {offsets = [0, 33, 0], sizes = [1, 16, 32], strides = [1, 1, 1]} : vector<1x55x32xbf16> to vector<1x16x32xbf16>
    %109 = vector.extract_strided_slice %22 {offsets = [0, 34, 0], sizes = [1, 16, 32], strides = [1, 1, 1]} : vector<1x55x32xbf16> to vector<1x16x32xbf16>
    %110 = vector.extract_strided_slice %22 {offsets = [0, 35, 0], sizes = [1, 16, 32], strides = [1, 1, 1]} : vector<1x55x32xbf16> to vector<1x16x32xbf16>
    %111 = tpu.concatenate %107, %108, %109, %110 in 2 : vector<1x16x32xbf16>, vector<1x16x32xbf16>, vector<1x16x32xbf16>, vector<1x16x32xbf16> -> vector<1x16x128xbf16>
    %112 = vector.shape_cast %111 : vector<1x16x128xbf16> to vector<16x128xbf16>
    %c1024 = arith.constant 1024 : index
    %c0_28 = arith.constant 0 : index
    %113 = vector.load %arg5[%c1024, %c0_28] : memref<1408x128xbf16, #tpu.memory_space<vmem>>, vector<128x128xbf16>
    %cst_29 = arith.constant dense<0.000000e+00> : vector<16x128xf32>
    %114 = tpu.matmul %112, %113, %cst_29 {dimension_numbers = #tpu.dot_dimension_numbers<[1], [0], [0], [1], [0, 0, 1, 1], [], []>} : vector<16x128xbf16>, vector<128x128xbf16>, vector<16x128xf32> -> vector<16x128xf32>
    %115 = arith.addf %106, %114 : vector<16x128xf32>
    %116 = vector.extract_strided_slice %22 {offsets = [0, 36, 0], sizes = [1, 16, 32], strides = [1, 1, 1]} : vector<1x55x32xbf16> to vector<1x16x32xbf16>
    %117 = vector.extract_strided_slice %22 {offsets = [0, 37, 0], sizes = [1, 16, 32], strides = [1, 1, 1]} : vector<1x55x32xbf16> to vector<1x16x32xbf16>
    %118 = vector.extract_strided_slice %22 {offsets = [0, 38, 0], sizes = [1, 16, 32], strides = [1, 1, 1]} : vector<1x55x32xbf16> to vector<1x16x32xbf16>
    %119 = vector.extract_strided_slice %22 {offsets = [0, 39, 0], sizes = [1, 16, 32], strides = [1, 1, 1]} : vector<1x55x32xbf16> to vector<1x16x32xbf16>
    %120 = tpu.concatenate %116, %117, %118, %119 in 2 : vector<1x16x32xbf16>, vector<1x16x32xbf16>, vector<1x16x32xbf16>, vector<1x16x32xbf16> -> vector<1x16x128xbf16>
    %121 = vector.shape_cast %120 : vector<1x16x128xbf16> to vector<16x128xbf16>
    %c1152 = arith.constant 1152 : index
    %c0_30 = arith.constant 0 : index
    %122 = vector.load %arg5[%c1152, %c0_30] : memref<1408x128xbf16, #tpu.memory_space<vmem>>, vector<128x128xbf16>
    %cst_31 = arith.constant dense<0.000000e+00> : vector<16x128xf32>
    %123 = tpu.matmul %121, %122, %cst_31 {dimension_numbers = #tpu.dot_dimension_numbers<[1], [0], [0], [1], [0, 0, 1, 1], [], []>} : vector<16x128xbf16>, vector<128x128xbf16>, vector<16x128xf32> -> vector<16x128xf32>
    %124 = arith.addf %115, %123 : vector<16x128xf32>
    %125 = vector.shape_cast %33 : vector<1x16x128xbf16> to vector<16x128xbf16>
    %c1280 = arith.constant 1280 : index
    %c0_32 = arith.constant 0 : index
    %126 = vector.load %arg5[%c1280, %c0_32] : memref<1408x128xbf16, #tpu.memory_space<vmem>>, vector<128x128xbf16>
    %cst_33 = arith.constant dense<0.000000e+00> : vector<16x128xf32>
    %127 = tpu.matmul %125, %126, %cst_33 {dimension_numbers = #tpu.dot_dimension_numbers<[1], [0], [0], [1], [0, 0, 1, 1], [], []>} : vector<16x128xbf16>, vector<128x128xbf16>, vector<16x128xf32> -> vector<16x128xf32>
    %128 = arith.addf %124, %127 : vector<16x128xf32>
    %cst_34 = arith.constant dense<0.000000e+00> : vector<128xf32>
    %129 = vector.multi_reduction <add>, %128, %cst_34 [0] : vector<16x128xf32> to vector<128xf32>
    %130 = vector.shape_cast %129 : vector<128xf32> to vector<1x128xf32>
    %c0_35 = arith.constant 0 : index
    %c0_36 = arith.constant 0 : index
    %c0_37 = arith.constant 0 : index
    %131 = vector.load %arg7[%c0_35, %c0_36, %c0_37] : memref<1x1x128xf32, #tpu.memory_space<vmem>>, vector<1x1x128xf32>
    %132 = vector.shape_cast %131 : vector<1x1x128xf32> to vector<1x128xf32>
    %133 = vector.shape_cast %130 : vector<1x128xf32> to vector<1x1x128xf32>
    tpu.vector_store %arg7[%c0_35, %c0_36, %c0_37], %133 {strides = array<i32>} : memref<1x1x128xf32, #tpu.memory_space<vmem>>, vector<1x1x128xf32>,
    %134 = arith.mulf %128, %128 : vector<16x128xf32>
    %cst_38 = arith.constant dense<0.000000e+00> : vector<128xf32>
    %135 = vector.multi_reduction <add>, %134, %cst_38 [0] : vector<16x128xf32> to vector<128xf32>
    %136 = vector.shape_cast %135 : vector<128xf32> to vector<1x128xf32>
    %c0_39 = arith.constant 0 : index
    %c0_40 = arith.constant 0 : index
    %c0_41 = arith.constant 0 : index
    %137 = vector.load %arg8[%c0_39, %c0_40, %c0_41] : memref<1x1x128xf32, #tpu.memory_space<vmem>>, vector<1x1x128xf32>
    %138 = vector.shape_cast %137 : vector<1x1x128xf32> to vector<1x128xf32>
    %139 = vector.shape_cast %136 : vector<1x128xf32> to vector<1x1x128xf32>
    tpu.vector_store %arg8[%c0_39, %c0_40, %c0_41], %139 {strides = array<i32>} : memref<1x1x128xf32, #tpu.memory_space<vmem>>, vector<1x1x128xf32>,
    %140 = vector.shape_cast %128 : vector<16x128xf32> to vector<1x16x128xf32>
    %141 = arith.truncf %140 : vector<1x16x128xf32> to vector<1x16x128xbf16>
    %c0_42 = arith.constant 0 : index
    %c0_43 = arith.constant 0 : index
    %c0_44 = arith.constant 0 : index
    %142 = vector.load %arg6[%c0_42, %c0_43, %c0_44] : memref<1x16x128xbf16, #tpu.memory_space<vmem>>, vector<1x16x128xbf16>
    tpu.vector_store %arg6[%c0_42, %c0_43, %c0_44], %141 {strides = array<i32>} : memref<1x16x128xbf16, #tpu.memory_space<vmem>>, vector<1x16x128xbf16>,
    return
  }
  func.func @transform_0(%arg0: i32) -> (i32, i32, i32) {
    %c0_i32 = arith.constant 0 : i32
    %c0_i32_0 = arith.constant 0 : i32
    %c0_i32_1 = arith.constant 0 : i32
    return %arg0, %c0_i32, %c0_i32_0 : i32, i32, i32
  }
  func.func @transform_1(%arg0: i32) -> (i32, i32) {
    %c0_i32 = arith.constant 0 : i32
    %c0_i32_0 = arith.constant 0 : i32
    %c0_i32_1 = arith.constant 0 : i32
    return %c0_i32, %c0_i32_0 : i32, i32
  }
  func.func @transform_2(%arg0: i32) -> (i32, i32) {
    %c0_i32 = arith.constant 0 : i32
    %c0_i32_0 = arith.constant 0 : i32
    %c0_i32_1 = arith.constant 0 : i32
    return %c0_i32, %c0_i32_0 : i32, i32
  }
  func.func @transform_3(%arg0: i32) -> (i32, i32) {
    %c0_i32 = arith.constant 0 : i32
    %c0_i32_0 = arith.constant 0 : i32
    %c0_i32_1 = arith.constant 0 : i32
    return %c0_i32, %c0_i32_0 : i32, i32
  }
  func.func @transform_4(%arg0: i32) -> (i32, i32) {
    %c0_i32 = arith.constant 0 : i32
    %c0_i32_0 = arith.constant 0 : i32
    %c0_i32_1 = arith.constant 0 : i32
    return %c0_i32, %c0_i32_0 : i32, i32
  }
  func.func @transform_5(%arg0: i32) -> (i32, i32, i32) {
    %c0_i32 = arith.constant 0 : i32
    %c0_i32_0 = arith.constant 0 : i32
    %c0_i32_1 = arith.constant 0 : i32
    return %arg0, %c0_i32, %c0_i32_0 : i32, i32, i32
  }
  func.func @transform_6(%arg0: i32) -> (i32, i32, i32) {
    %c0_i32 = arith.constant 0 : i32
    %c0_i32_0 = arith.constant 0 : i32
    %c0_i32_1 = arith.constant 0 : i32
    return %arg0, %c0_i32, %c0_i32_0 : i32, i32, i32
  }
  func.func @transform_7(%arg0: i32) -> (i32, i32, i32) {
    %c0_i32 = arith.constant 0 : i32
    %c0_i32_0 = arith.constant 0 : i32
    %c0_i32_1 = arith.constant 0 : i32
    return %arg0, %c0_i32, %c0_i32_0 : i32, i32, i32
  }
}

</mosaic_0001>

<bundles_post_ra>
// kernel: inception_time_forward.7
= control target key start
LH: loop header
LB: loop body
LE: loop exit
PB: predicated region body
PF: predicated region fallthrough
CT: control target
= control target key end

     0   :  { %s299_s12 = smov 0   ;;  %s322_s0 = inlined_call_operand.vmem [shape: bf16[2,16,128], index: 0, kind: input, shape index: {}]   ;;  %s323_s1 = inlined_call_operand.vmem [shape: f32[1,128], index: 1, kind: input, shape index: {}]   ;;  %s324_s2 = inlined_call_operand.vmem [shape: f32[1,128], index: 2, kind: input, shape index: {}]   ;;  %s325_s3 = inlined_call_operand.vmem [shape: f32[2,1,128], index: 3, kind: output, shape index: {}]  }
   0x1 LB: > { %s247_s13 = sadd.s32 4294967295, %s277_s12   ;;  %p251_p0 = scmp.ge.s32.totalorder %s277_s12, 1  ;;  %s277_s12 = sphi %s299_s12, %s13_s12  }
   0x2   : > { %p137_p1 = scmp.lt.s32.totalorder %s277_s12, 3 }
   0x4   : > { %p138_p2 = pnand %p251_p0, %p137_p1 }
   0x5   : > { %p159_p3 = scmp.lt.s32.totalorder (!%p138_p2), %s247_s13, 1  ;;  %v254_v1 = vld [vmem:[%s323_s1] ss:$0 sm:$0xff] (!%p138_p2) }
   0x6   : > { %141 = sbr.rel (%p138_p2) target bundleno = 42 (0x2a), region = 32  ;;  %v255_v4 = vld [vmem:[%s324_s2] ss:$0 sm:$0xff] (!%p138_p2) }
   0xd   : > { %s327_s13 = smov (!%p159_p3, %s247_s13), 1 }
   0xe   : > { %s258_s14 = sshll.u32 %s327_s13, 3  ;;  %s166_s24 = scalar_lea.vmem %s325_s3, %s327_s13 }
   0xf   : > { %s163_s17 = scalar_lea.vmem %s322_s0, %s258_s14 }
  0x10   : > { %v260_v0 = vld [vmem:[%s163_s17] sm:$0xff]  }
  0x11   : > { %v261_v2 = vunpack.c.l.bf16 %v260_v0  ;;  %v262_v3 = vunpack.c.h.bf16 %v260_v0 }
  0x13   : > { %v178_v5 = vmul.f32 %v261_v2, %v254_v1  ;;  %v179_v6 = vmul.f32 %v262_v3, %v254_v1 }
  0x15   : > { %v187_v7 = vadd.f32 %v255_v4, %v178_v5  ;;  %v188_v8 = vadd.f32 %v255_v4, %v179_v6 }
  0x17   : > { %v189_v9 = vmax.f32 %v187_v7, 0.0  ;;  %v190_v10 = vmax.f32 %v188_v8, 0.0 }
  0x19   : > { %v191_v11 = vadd.f32 %v190_v10, %v189_v9 }
  0x1b   : > { %v192_v12 = vrot.slane %v191_v11, 4 }
  0x1d   : > { %v193_v13 = vadd.f32 %v192_v12, %v191_v11 }
  0x1f   : > { %v194_v14 = vrot.slane %v193_v13, 2 }
  0x21   : > { %v195_v15 = vadd.f32 %v194_v14, %v193_v13 }
  0x23   : > { %v196_v16 = vrot.slane %v195_v15, 1 }
  0x25   : > { %v197_v17 = vadd.f32 %v196_v16, %v195_v15 }
  0x27   : > { %v198_v18 = vmul.f32 0.0625, %v197_v17 }
  0x29   : > { %199 = vst [vmem:[%s166_s24] sm:$0x1] %v198_v18 }
  0x2a PF: > { %s13_s12 = sadd.s32 1, %s277_s12  }
  0x2b   : > { %p10_p4 = scmp.ge.s32.totalorder %s13_s12, 4  }
  0x2d   :  { %12 = sbr.rel (!%p10_p4) target bundleno = 1 (0x1), region = 62 }

// kernel: inception_time_forward.4
= control target key start
LH: loop header
LB: loop body
LE: loop exit
PB: predicated region body
PF: predicated region fallthrough
CT: control target
= control target key end

     0   :  { %11 = vsyncpa [#allocation3], 0  ;;  %s2834_s0 = inlined_call_operand.vmem [shape: f32[2,16,6], index: 0, kind: input, shape index: {}]   ;;  %s2835_s1 = inlined_call_operand.hbm [shape: bf16[6,32], index: 1, kind: input, shape index: {}]   ;;  %s2836_s2 = inlined_call_operand.hbm [shape: bf16[1286,128], index: 2, kind: input, shape index: {}]   ;;  %s2837_s3 = inlined_call_operand.vmem [shape: bf16[2,16,128], index: 3, kind: output, shape index: {0}]   ;;  %s2838_s4 = inlined_call_operand.vmem [shape: f32[2,1,128], index: 4, kind: output, shape index: {1}]   ;;  %s2839_s5 = inlined_call_operand.vmem [shape: f32[2,1,128], index: 5, kind: output, shape index: {2}]  }
   0x1   :  { %12 = vsyncpa [#allocation5], 0  ;;  %s2501_s18 = smov 0  }
   0x2 LB: > { %s2507_s19 = sadd.s32 4294967295, %s2459_s18   ;;  %p1822_p0 = scmp.ge.s32.totalorder %s2459_s18, 1  ;;  %s2459_s18 = sphi %s2501_s18, %s18_s18  }
   0x3   : > { %p169_p1 = scmp.lt.s32.totalorder %s2459_s18, 3  ;;  %p2840_p2 = scmp.eq.s32.totalorder %s2507_s19, 0 }
   0x4   : > { %s2461_s20 = smov [#allocation2]   ;;  %s2462_s23 = smov [#allocation4]  }
   0x5   : > { %s182_s21 = sshll.u32 %s2461_s20, 4  ;;  %p2512_p3 = pnand %p1822_p0, %p169_p1  ;;  %s183_s21 = int_to_ptr.vmem [resolvable:$true] %s182_s21 }
   0x6   : > { %s192_s24 = sshll.u32 %s2462_s23, 4  ;;  %s2389_s28 = scalar_lea.hbm %s2835_s1, 64  ;;  %s2524_s24 = int_to_ptr.vmem [resolvable:$true] %s192_s24 }
   0x7   : > { %s2842_s22 = scalar_select %p2512_p3, 1, 0 }
   0x8   : > { %p2280_p4 = pneg %p2512_p3  ;;  %p2390_p6 = scmp.ne.s32.totalorder %s2835_s1, %s2389_s28 }
   0x9   : > { %p2396_p10 = scmp.lt.u32.totalorder %s2389_s28, %s2835_s1 }
   0xa   : > { %p2520_p5 = pnand %p2840_p2, %p2280_p4 }
   0xc   : > { %p2391_p7 = pneg %p2520_p5 }
   0xe   : > { %p2392_p8 = pnand %p2391_p7, %p2390_p6 }
  0x10   : > { %p2393_p9 = pneg %p2392_p8 }
  0x12   : > { %p2398_p11 = pnand %p2396_p10, %p2393_p9 }
  0x14   : > { %2401 = shalt.err (!%p2398_p11)
}
  0x15   : > { %s2402_s8 = scalar_lea.vmem %s183_s21, 64  ;;  %p2410_p1 = scmp.lt.s32.totalorder %s183_s21, %s183_s21 }
  0x16   : > { %p2403_p12 = scmp.ne.s32.totalorder %s183_s21, %s2402_s8  ;;  %p2411_p4 = scmp.lt.s32.totalorder %s2402_s8, %s2402_s8 }
  0x18   : > { %p2405_p13 = pnand %p2403_p12, %p2391_p7  ;;  %p2412_p2 = por %p2411_p4, %p2410_p1 }
  0x1a   : > { %p2406_p0 = pneg %p2405_p13 }
  0x1c   : > { %p2413_p3 = pnand %p2412_p2, %p2406_p0 }
  0x1e   : > { %2416 = shalt.err (!%p2413_p3)
}
  0x1f   : > { %2283 = dma.hbm_to_vmem [thread:$0]  (!%p2520_p5), %s2835_s1, 64, %s183_s21, [#allocation3]  }
  0x20   : > { %s2417_s13 = scalar_lea.hbm %s2836_s2, 10304 }
  0x21   : > { %p2418_p6 = scmp.ne.s32.totalorder %s2836_s2, %s2417_s13  ;;  %p2424_p3 = scmp.lt.u32.totalorder %s2417_s13, %s2836_s2 }
  0x23   : > { %p2420_p8 = pnand %p2418_p6, %p2391_p7 }
  0x25   : > { %p2421_p2 = pneg %p2420_p8 }
  0x27   : > { %p2426_p9 = pnand %p2424_p3, %p2421_p2 }
  0x29   : > { %2429 = shalt.err (!%p2426_p9)
}
  0x2a   : > { %s2430_s20 = scalar_lea.vmem %s2524_s24, 10304  ;;  %p2438_p13 = scmp.lt.s32.totalorder %s2524_s24, %s2524_s24 }
  0x2b   : > { %p2431_p10 = scmp.ne.s32.totalorder %s2524_s24, %s2430_s20  ;;  %p2439_p0 = scmp.lt.s32.totalorder %s2430_s20, %s2430_s20 }
  0x2d   : > { %p2433_p11 = pnand %p2431_p10, %p2391_p7  ;;  %p2440_p1 = por %p2439_p0, %p2438_p13 }
  0x2f   : > { %p2434_p12 = pneg %p2433_p11 }
  0x31   : > { %p2441_p4 = pnand %p2440_p1, %p2434_p12 }
  0x33   : > { %2444 = shalt.err (!%p2441_p4)
}
  0x34   : > { %s2463_s21 = smov 64   ;;  %s2464_s23 = smov 4  }
  0x35   : > { %2286 = dma.hbm_to_vmem [thread:$0]  (!%p2520_p5), %s2836_s2, 10304, %s2524_s24, [#allocation5], %s2463_s21, %s2463_s21, %s2464_s23  }
  0x36   : > { %p2844_p6 = scmp.ne.s32.totalorder %s2842_s22, 0 }
  0x37   : > { %p2845_p7 = scmp.eq.s32.totalorder (!%p2844_p6), %s2507_s19, 0 }
  0x38   : > { %216 = sbr.rel (%p2844_p6) target bundleno = 804 (0x324), region = 32 }
  0x3f   : > { %2450 = dma.done.wait (%p2845_p7), [#allocation3], 64   ;;  %p2846_p8 = pmov %p2845_p7 }
  0x40   : > { %p2847_p2 = pmov %p2845_p7 }
  0x41   : > { %2452 = vsyncadd (%p2846_p8), [#allocation3], 4294967232 }
  0x42   : > { %2454 = dma.done.wait (%p2847_p2), [#allocation5], 10304   ;;  %p2848_p3 = pmov %p2847_p2 }
  0x43   : > { %p254_p9 = scmp.lt.s32.totalorder %s2507_s19, 1  ;;  %v2465_v0 = vmov 0.0   ;;  %vm2466_vm0 = vmmov 0   ;;  %vm279_vm1 = vcmask 1042432   ;;  %v274_v1 = vld [vmem:[#allocation2] sm:$0x7] }
  0x44   : > { %2456 = vsyncadd (%p2848_p3), [#allocation5], 4294956992  ;;  %2022 = vmatprep.subr.bf16.mxu0 %v2465_v0  ;;  %2024 = vmatprep.mubr.msk.bf16.mxu0 %vm2466_vm0, %v2465_v0  ;;  %v281_v3 = vsel %vm279_vm1, %v274_v1, 0  ;;  %vm275_vm2 = vcmask 48128   ;;  %v2309_v6 = vld [vmem:[#allocation4 + $0x140] sm:$0xff]   ;;  %v2310_v8 = vld [vmem:[#allocation4 + $0x148] sm:$0xff]  }
  0x45   : > { %s2850_s19 = smov (!%p254_p9, %s2507_s19), 1  ;;  %2128 = vmatprep.subr.bf16.mxu1 %v2465_v0  ;;  %2144 = vmatprep.mubr.msk.bf16.mxu1 %vm2466_vm0, %v2465_v0  ;;  %v2312_v7 = vld [vmem:[#allocation4 + $0x40] sm:$0xff]   ;;  %v2311_v9 = vld [vmem:[#allocation4 + $0x150] sm:$0xff]   ;;  %v2313_v10 = vld [vmem:[#allocation4 + $0x158] sm:$0xff]   ;;  %vm334_vm3 = vcmask 1041408   ;;  %s2467_s29 = smov 64  }
  0x46   : > { %s1919_s22 = sshll.u32 %s2850_s19, 4  ;;  %2023 = vmatpush3.bf16.msra.mxu0 %v281_v3  ;;  %2129 = vmatpush3.bf16.msra.mxu1 %v2309_v6  ;;  %v2314_v12 = vld [vmem:[#allocation4 + $0x48] sm:$0xff]   ;;  %v2315_v13 = vld [vmem:[#allocation4 + $0x160] sm:$0xff]   ;;  %vm335_vm4 = vsmask.f32 1280  ;;  %v2316_v20 = vld [vmem:[#allocation4 + $0x50] sm:$0xff]   ;;  %s266_s13 = scalar_lea.vmem %s2838_s4, %s2850_s19 }
  0x47   : > { %s258_s28 = scalar_lea.vmem %s2834_s0, %s1919_s22  ;;  %2028 = vmatprep.subr.bf16.mxu0 %v2465_v0  ;;  %2130 = vmatprep.subr.bf16.mxu1 %v2465_v0  ;;  %v2317_v21 = vld [vmem:[#allocation4 + $0x168] sm:$0xff]   ;;  %vm336_vm5 = vmand %vm334_vm3, %vm335_vm4  ;;  %v2318_v25 = vld [vmem:[#allocation4 + $0x58] sm:$0xff]   ;;  %vm354_vm6 = vcmask 1046528   ;;  %s2468_s30 = smov 32   ;;  %vm375_vm7 = vsmask.f32 7424 }
  0x48   : > { %v271_v2 = vld [vmem:[%s258_s28] sm:$0xff]  ;;  %v272_v4 = vld [vmem:[%s258_s28 + $0x8] sm:$0xff]  ;;  %v2322_v46 = vld [vmem:[#allocation4 + $0x68] sm:$0xff]   ;;  %s2469_s6 = smov 96   ;;  %vm398_vm8 = vsmask.f32 6400  ;;  %s269_s16 = scalar_lea.vmem %s2839_s5, %s2850_s19 }
  0x49   : > { %v2598_v5 = vpack.c.bf16 %v272_v4, %v271_v2  ;;  %v2319_v26 = vld [vmem:[#allocation4 + $0x170] sm:$0xff]   ;;  %v2320_v35 = vld [vmem:[#allocation4 + $0x60] sm:$0xff]   ;;  %v2321_v36 = vld [vmem:[#allocation4 + $0x178] sm:$0xff]   ;;  %v2470_v53 = vmov 0   ;;  %vm410_vm9 = vcmask 261120   ;;  %vm413_vm10 = vcmask 523264  }
  0x4a   : > { %2131 = vmatpush3.bf16.msra.mxu1 %v2310_v8  ;;  %v2324_v50 = vld [vmem:[#allocation4 + $0x70] sm:$0xff]   ;;  %v2326_v52 = vld [vmem:[#allocation4 + $0x78] sm:$0xff]   ;;  %v381_v54 = vrot.slane %v2470_v53, 1  ;;  %v400_v56 = vrot.slane %v2470_v53, 2  ;;  %vm416_vm11 = vcmask 785408   ;;  %vm364_vm12 = vcmask 1045504  }
  0x4b   : > { %2025 = vmatmul.mubr.msk.bf16.vlgmr.msra.gmra.mrb[0].mxu0 %vm275_vm2, %v2598_v5  ;;  %2132 = vmatprep.subr.bf16.mxu1 %v2465_v0  ;;  %vm666_vm13 = vcmask 1043456   ;;  %vm343_vm14 = vcmask 1040384   ;;  %s1920_s7 = sshll.u32 %s2850_s19, 3 }
  0x4c   : > { %2044 = vmatprep.mubr.msk.bf16.mxu0 %vm2466_vm0, %v2465_v0  ;;  %2029 = vmatpush3.bf16.msra.mxu0 %v2312_v7  ;;  %v401_v58 = vor.u32 %v400_v56, %v381_v54  ;;  %v2333_v56 = vld [vmem:[#allocation4 + $0x1a8] sm:$0xff]   ;;  %s263_s10 = scalar_lea.vmem %s2837_s3, %s1920_s7 }
  0x4d   : > { %2030 = vmatprep.subr.bf16.mxu0 %v2465_v0 }
  0x4e   : > { %2133 = vmatpush3.bf16.msra.mxu1 %v2311_v9 }
  0x4f   : > { %2134 = vmatprep.subr.bf16.mxu1 %v2465_v0 }
  0x50   : > { %2031 = vmatpush3.bf16.msra.mxu0 %v2314_v12 }
  0x51   : > { %2032 = vmatprep.subr.bf16.mxu0 %v2465_v0 }
  0x52   : > { %2135 = vmatpush3.bf16.msra.mxu1 %v2313_v10 }
  0x53   : > { %2136 = vmatprep.subr.bf16.mxu1 %v2465_v0 }
  0x54   : > { %2033 = vmatpush3.bf16.msra.mxu0 %v2316_v20 }
  0x55   : > { %2034 = vmatprep.subr.bf16.mxu0 %v2465_v0 }
  0x56   : > { %2137 = vmatpush3.bf16.msra.mxu1 %v2315_v13 }
  0x57   : > { %2138 = vmatprep.subr.bf16.mxu1 %v2465_v0 }
  0x58   : > { %2035 = vmatpush3.bf16.msra.mxu0 %v2318_v25 }
  0x59   : > { %2036 = vmatprep.subr.bf16.mxu0 %v2465_v0 }
  0x5a   : > { %2139 = vmatpush3.bf16.msra.mxu1 %v2317_v21 }
  0x5b   : > { %2140 = vmatprep.subr.bf16.mxu1 %v2465_v0 }
  0x5c   : > { %2037 = vmatpush3.bf16.msra.mxu0 %v2320_v35 }
  0x5d   : > { %2038 = vmatprep.subr.bf16.mxu0 %v2465_v0 }
  0x5e   : > { %2141 = vmatpush3.bf16.msra.mxu1 %v2319_v26 }
  0x5f   : > { %2142 = vmatprep.subr.bf16.mxu1 %v2465_v0 }
  0x60   : > { %2039 = vmatpush3.bf16.msra.mxu0 %v2322_v46 }
  0x61   : > { %2040 = vmatprep.subr.bf16.mxu0 %v2465_v0 }
  0x62   : > { %2143 = vmatpush3.bf16.msra.mxu1 %v2321_v36 }
  0x63   : > { %2148 = vmatprep.subr.bf16.mxu1 %v2465_v0 }
  0x64   : > { %2041 = vmatpush3.bf16.msra.mxu0 %v2324_v50 }
  0x65   : > { %2042 = vmatprep.subr.bf16.mxu0 %v2465_v0 }
  0x68   : > { %2043 = vmatpush3.bf16.msra.mxu0 %v2326_v52 }
  0x69   : > { %2048 = vmatprep.subr.bf16.mxu0 %v2465_v0 }
 0x11e   : > { %v317_v11 = vpop.f32.mrb[0].mxu0 }
 0x11f   : > { %v2026_v14 = vpop.f32.mrb[1].mxu0 }
 0x120   : > { %v320_v15 = vpop.f32.mrb[2].mxu0 }
 0x121   : > { %v324_v16 = vpack.c.bf16 %v320_v15, %v317_v11  ;;  %v2027_v17 = vpop.f32.mrb[3].mxu0 }
 0x123   : > { %v326_v18 = vshrl.u32 %v324_v16, 16  ;;  %v329_v19 = vshll.u32 %v324_v16, 16 }
 0x125   : > { %v328_v22 = vrot.slane %v326_v18, 6  ;;  %v331_v23 = vrot.slane %v329_v19, 7  ;;  %v2323_v18 = vld [vmem:[#allocation4 + $0x180] sm:$0xff]  }
 0x127   : > { %v332_v24 = vor.u32 %v331_v23, %v328_v22  ;;  %v2325_v22 = vld [vmem:[#allocation4 + $0x188] sm:$0xff]  }
 0x129   : > { %v2615_v27 = vsel %vm336_vm5, 0, %v332_v24  ;;  %v2617_v28 = vsel %vm336_vm5, %v332_v24, 0 }
 0x12a   : > { %v2620_v29 = vrot.slane %v2617_v28, 1  ;;  %v880_v30 = vshll.u32 %v2617_v28, 16  ;;  %v891_v31 = vshrl.u32 %v2617_v28, 16  ;;  %v394_v32 = vrot.slane %v2615_v27, 1 }
 0x12b   : > { %v384_v33 = vshll.u32 %v2615_v27, 16  ;;  %v402_v34 = vshrl.u32 %v2615_v27, 16 }
 0x12c   : > { %1016 = vrot.lane.b32.xlu1 %v2620_v29, %s2467_s29  ;;  %v882_v37 = vrot.slane %v880_v30, 1  ;;  %v893_v39 = vrot.slane %v891_v31, 1  ;;  %v894_v40 = vrot.slane %v880_v30, 2  ;;  %v888_v42 = vsel %vm354_vm6, %v394_v32, %v2620_v29 }
 0x12d   : > { %v386_v38 = vrot.slane %v384_v33, 1  ;;  %v404_v43 = vrot.slane %v402_v34, 1  ;;  %v405_v45 = vrot.slane %v384_v33, 2  ;;  %v395_v57 = vsel %vm354_vm6, %v381_v54, %v394_v32 }
 0x12e   : > { %v1013_v41 = vor.u32 %v891_v31, %v882_v37  ;;  %v895_v47 = vor.u32 %v894_v40, %v893_v39  ;;  %v1370_v63 = vsel %vm354_vm6, %v2620_v29, %v381_v54  ;;  %v2327_v29 = vld [vmem:[#allocation4 + $0x190] sm:$0xff]   ;;  %v2328_v39 = vld [vmem:[#allocation4] sm:$0xff]   ;;  %v2329_v40 = vld [vmem:[#allocation4 + $0x198] sm:$0xff]  }
 0x12f   : > { %v436_v44 = vor.u32 %v402_v34, %v386_v38  ;;  %v406_v49 = vor.u32 %v405_v45, %v404_v43  ;;  %v387_v55 = vsel %vm375_vm7, %v381_v54, %v386_v38 }
 0x130   : > { %1014 = vrot.lane.b32.xlu0 %v1013_v41, %s2468_s30  ;;  %889 = vrot.lane.b32.xlu1 %v888_v42, %s2467_s29  ;;  %v1367_v59 = vsel %vm375_vm7, %v1013_v41, %v381_v54  ;;  %v1373_v61 = vsel %vm398_vm8, %v895_v47, %v401_v58  ;;  %v1250_v62 = vsel %vm398_vm8, %v404_v43, %v895_v47 }
 0x131   : > { %v883_v48 = vsel %vm375_vm7, %v436_v44, %v882_v37  ;;  %v896_v51 = vsel %vm398_vm8, %v406_v49, %v895_v47  ;;  %v407_v60 = vsel %vm398_vm8, %v401_v58, %v406_v49  ;;  %v762_v1 = vsel %vm398_vm8, %v381_v54, %v406_v49 }
 0x134   : > { %1018 = vrot.lane.b32.xlu1 %v895_v47, %s2469_s6  ;;  %884 = vrot.lane.b32.xlu0 %v883_v48, %s2468_s30  ;;  %v2330_v48 = vld [vmem:[#allocation4 + $0x8] sm:$0xff]  }
 0x138   : > { %437 = vrot.lane.b32.xlu1 %v436_v44, %s2468_s30  ;;  %897 = vrot.lane.b32.xlu0 %v896_v51, %s2469_s6 }
 0x13c   : > { %439 = vrot.lane.b32.xlu1 %v394_v32, %s2467_s29  ;;  %388 = vrot.lane.b32.xlu0 %v387_v55, %s2468_s30  ;;  %v2332_v55 = vld [vmem:[#allocation4 + $0x10] sm:$0xff]  }
 0x140   : > { %441 = vrot.lane.b32.xlu1 %v406_v49, %s2469_s6  ;;  %396 = vrot.lane.b32.xlu0 %v395_v57, %s2467_s29  ;;  %v2331_v49 = vld [vmem:[#allocation4 + $0x1a0] sm:$0xff]  }
 0x144   : > { %1368 = vrot.lane.b32.xlu1 %v1367_v59, %s2468_s30  ;;  %408 = vrot.lane.b32.xlu0 %v407_v60, %s2469_s6 }
 0x148   : > { %1374 = vrot.lane.b32.xlu1 %v1373_v61, %s2469_s6  ;;  %1251 = vrot.lane.b32.xlu0 %v1250_v62, %s2469_s6  ;;  %v2334_v62 = vld [vmem:[#allocation4 + $0x18] sm:$0xff]  }
 0x14c   : > { %1371 = vrot.lane.b32.xlu0 %v1370_v63, %s2467_s29  ;;  %1490 = vrot.lane.b32.xlu1 %v381_v54, %s2468_s30  ;;  %v2335_v63 = vld [vmem:[#allocation4 + $0x1b0] sm:$0xff]  }
 0x150   : > { %763 = vrot.lane.b32.xlu0 %v762_v1, %s2469_s6  ;;  %1494 = vrot.lane.b32.xlu1 %v401_v58, %s2469_s6 }
 0x154   : > { %1492 = vrot.lane.b32.xlu0 %v381_v54, %s2467_s29 }
 0x19e   : > { %v1017_v2 = vpop.permute.xlu1 %1016 }
 0x1a2   : > { %v1015_v3 = vpop.permute.xlu0 %1014  ;;  %v890_v4 = vpop.permute.xlu1 %889 }
 0x1a3   : > { %v1021_v6 = vsel %vm410_vm9, %v2617_v28, %v1015_v3 }
 0x1a4   : > { %v1023_v10 = vsel %vm413_vm10, %v1021_v6, %v1017_v2 }
 0x1a6   : > { %v1019_v7 = vpop.permute.xlu1 %1018  ;;  %v885_v8 = vpop.permute.xlu0 %884 }
 0x1a7   : > { %v900_v9 = vsel %vm410_vm9, %v2615_v27, %v885_v8  ;;  %v2674_v11 = vsel %vm416_vm11, %v1023_v10, %v1019_v7  ;;  %v2336_v7 = vld [vmem:[#allocation4 + $0x20] sm:$0xff]   ;;  %v2337_v8 = vld [vmem:[#allocation4 + $0x1b8] sm:$0xff]  }
 0x1a8   : > { %v902_v13 = vsel %vm413_vm10, %v900_v9, %v890_v4  ;;  %v1045_v16 = vrot.slane %v2674_v11, 2  ;;  %v1273_v46 = vrot.slane %v2674_v11, 6 }
 0x1aa   : > { %v438_v12 = vpop.permute.xlu1 %437  ;;  %v898_v14 = vpop.permute.xlu0 %897 }
 0x1ab   : > { %v2678_v15 = vsel %vm416_vm11, %v902_v13, %v898_v14  ;;  %v444_v25 = vsel %vm410_vm9, %v2615_v27, %v438_v12  ;;  %v1156_v14 = vrot.slane %v2674_v11, 4  ;;  %v2342_v11 = vld [vmem:[#allocation4 + $0x38] sm:$0xff]  }
 0x1ac   : > { %v1044_v17 = vrot.slane %v2678_v15, 2  ;;  %v1155_v12 = vrot.slane %v2678_v15, 4 }
 0x1ae   : > { %v440_v19 = vpop.permute.xlu1 %439  ;;  %v389_v20 = vpop.permute.xlu0 %388  ;;  %v1046_v21 = vsel %vm364_vm12, %v1044_v17, %v1045_v16  ;;  %v2338_v16 = vld [vmem:[#allocation4 + $0x28] sm:$0xff]   ;;  %v2339_v17 = vld [vmem:[#allocation4 + $0x1c0] sm:$0xff]  }
 0x1af   : > { %2145 = vmatmul.mubr.bf16.vlgmr.msra.gmra.mrb[0].mxu1 %v1046_v21  ;;  %v446_v26 = vsel %vm413_vm10, %v444_v25, %v440_v19  ;;  %v412_v30 = vsel %vm410_vm9, 0, %v389_v20  ;;  %v2340_v19 = vld [vmem:[#allocation4 + $0x30] sm:$0xff]   ;;  %v2341_v20 = vld [vmem:[#allocation4 + $0x1c8] sm:$0xff]   ;;  %v2347_v25 = vld [vmem:[#allocation4 + $0x1e0] sm:$0xff]  }
 0x1b0   : > { %2149 = vmatpush3.bf16.msra.mxu1 %v2323_v18  ;;  %2164 = vmatprep.mubr.msk.bf16.mxu1 %vm2466_vm0, %v2465_v0  ;;  %v1157_v18 = vsel %vm666_vm13, %v1155_v12, %v1156_v14  ;;  %v2343_v21 = vld [vmem:[#allocation4 + $0x1d0] sm:$0xff]   ;;  %v1615_v12 = vld [vmem:[#allocation4 + $0x280] sm:$0x7] }
 0x1b1   : > { %2150 = vmatprep.subr.bf16.mxu1 %v2465_v0 }
 0x1b2   : > { %v442_v23 = vpop.permute.xlu1 %441  ;;  %v397_v24 = vpop.permute.xlu0 %396 }
 0x1b3   : > { %v448_v31 = vsel %vm416_vm11, %v446_v26, %v442_v23  ;;  %v415_v32 = vsel %vm413_vm10, %v412_v30, %v397_v24  ;;  %v2345_v23 = vld [vmem:[#allocation4 + $0x1d8] sm:$0xff]   ;;  %v2346_v24 = vld [vmem:[#allocation4 + $0x88] sm:$0xff]   ;;  %v2348_v26 = vld [vmem:[#allocation4 + $0x90] sm:$0xff]  }
 0x1b4   : > { %2151 = vmatpush3.bf16.msra.mxu1 %v2325_v22  ;;  %v469_v36 = vrot.slane %v448_v31, 2  ;;  %v668_v37 = vrot.slane %v448_v31, 4  ;;  %v785_v59 = vrot.slane %v448_v31, 6  ;;  %v2344_v22 = vld [vmem:[#allocation4 + $0x80] sm:$0xff]   ;;  %v2350_v30 = vld [vmem:[#allocation4 + $0x98] sm:$0xff]   ;;  %v2351_v31 = vld [vmem:[#allocation4 + $0x1f0] sm:$0xff]  }
 0x1b5   : > { %2152 = vmatprep.subr.bf16.mxu1 %v2465_v0 }
 0x1b6   : > { %v1369_v33 = vpop.permute.xlu1 %1368  ;;  %v409_v34 = vpop.permute.xlu0 %408 }
 0x1b7   : > { %v2694_v35 = vsel %vm416_vm11, %v415_v32, %v409_v34  ;;  %v1377_v50 = vsel %vm410_vm9, %v2617_v28, %v1369_v33  ;;  %v2353_v33 = vld [vmem:[#allocation4 + $0x1f8] sm:$0xff]   ;;  %v2354_v34 = vld [vmem:[#allocation4 + $0xa8] sm:$0xff]  }
 0x1b8   : > { %v468_v27 = vrot.slane %v2694_v35, 2  ;;  %v667_v38 = vrot.slane %v2694_v35, 4  ;;  %2153 = vmatpush3.bf16.msra.mxu1 %v2327_v29  ;;  %v2349_v29 = vld [vmem:[#allocation4 + $0x1e8] sm:$0xff]  }
 0x1b9   : > { %2154 = vmatprep.subr.bf16.mxu1 %v2465_v0 }
 0x1ba   : > { %v1252_v41 = vpop.permute.xlu0 %1251  ;;  %v470_v42 = vsel %vm364_vm12, %v468_v27, %v469_v36  ;;  %v2701_v43 = vsel %vm666_vm13, %v667_v38, %v668_v37  ;;  %v1375_v44 = vpop.permute.xlu1 %1374  ;;  %v2356_v36 = vld [vmem:[#allocation4 + $0xb0] sm:$0xff]   ;;  %v2357_v37 = vld [vmem:[#allocation4 + $0x208] sm:$0xff]   ;;  %v2358_v27 = vld [vmem:[#allocation4 + $0xb8] sm:$0xff]  }
 0x1bb   : > { %v1254_v45 = vsel %vm416_vm11, %v902_v13, %v1252_v41  ;;  %2045 = vmatmul.mubr.bf16.vlgmr.msra.gmra.mrb[4].mxu0 %v470_v42  ;;  %v2359_v38 = vld [vmem:[#allocation4 + $0x210] sm:$0xff]   ;;  %v2362_v41 = vld [vmem:[#allocation4 + $0xc8] sm:$0xff]   ;;  %v2363_v42 = vld [vmem:[#allocation4 + $0x220] sm:$0xff]  }
 0x1bc   : > { %v1272_v47 = vrot.slane %v1254_v45, 6  ;;  %2049 = vmatpush3.bf16.msra.mxu0 %v2328_v39  ;;  %2155 = vmatpush3.bf16.msra.mxu1 %v2329_v40  ;;  %v2360_v39 = vld [vmem:[#allocation4 + $0xc0] sm:$0xff]   ;;  %v2361_v40 = vld [vmem:[#allocation4 + $0x218] sm:$0xff]   ;;  %v2365_v45 = vld [vmem:[#allocation4 + $0x228] sm:$0xff]  }
 0x1bd   : > { %2050 = vmatprep.subr.bf16.mxu0 %v2465_v0  ;;  %2156 = vmatprep.subr.bf16.mxu1 %v2465_v0 }
 0x1be   : > { %v1372_v51 = vpop.permute.xlu0 %1371  ;;  %2064 = vmatprep.mubr.msk.bf16.mxu0 %vm2466_vm0, %v2465_v0  ;;  %v2712_v52 = vsel %vm334_vm3, %v1272_v47, %v1273_v46  ;;  %v1491_v54 = vpop.permute.xlu1 %1490  ;;  %v2367_v46 = vld [vmem:[#allocation4 + $0x230] sm:$0xff]   ;;  %v2368_v47 = vld [vmem:[#allocation4 + $0xe0] sm:$0xff]  }
 0x1bf   : > { %v1379_v53 = vsel %vm413_vm10, %v1377_v50, %v1372_v51  ;;  %v1497_v61 = vsel %vm410_vm9, 0, %v1491_v54  ;;  %v2371_v50 = vld [vmem:[#allocation4 + $0x240] sm:$0xff]   ;;  %v2372_v51 = vld [vmem:[#allocation4 + $0xf0] sm:$0xff]  }
 0x1c0   : > { %2051 = vmatpush3.bf16.msra.mxu0 %v2330_v48  ;;  %2157 = vmatpush3.bf16.msra.mxu1 %v2331_v49  ;;  %v2716_v57 = vsel %vm416_vm11, %v1379_v53, %v1375_v44  ;;  %v2364_v44 = vld [vmem:[#allocation4 + $0xd0] sm:$0xff]   ;;  %v2369_v48 = vld [vmem:[#allocation4 + $0x238] sm:$0xff]   ;;  %v2370_v49 = vld [vmem:[#allocation4 + $0xe8] sm:$0xff]  }
 0x1c1   : > { %2052 = vmatprep.subr.bf16.mxu0 %v2465_v0  ;;  %2158 = vmatprep.subr.bf16.mxu1 %v2465_v0  ;;  %v1520_v10 = vrot.slane %v2716_v57, 2  ;;  %v2374_v53 = vld [vmem:[#allocation4 + $0xf8] sm:$0xff]   ;;  %v2375_v54 = vld [vmem:[#allocation4 + $0x250] sm:$0xff]  }
 0x1c2   : > { %v764_v28 = vpop.permute.xlu0 %763  ;;  %v1495_v1 = vpop.permute.xlu1 %1494 }
 0x1c3   : > { %v766_v58 = vsel %vm416_vm11, %v415_v32, %v764_v28  ;;  %v2352_v32 = vld [vmem:[#allocation4 + $0xa0] sm:$0xff]  }
 0x1c4   : > { %v784_v60 = vrot.slane %v766_v58, 6  ;;  %2053 = vmatpush3.bf16.msra.mxu0 %v2332_v55  ;;  %2159 = vmatpush3.bf16.msra.mxu1 %v2333_v56  ;;  %v2376_v55 = vld [vmem:[#allocation4 + $0x100] sm:$0xff]   ;;  %v2377_v56 = vld [vmem:[#allocation4 + $0x258] sm:$0xff]   ;;  %v339_v58 = vunpack.c.l.bf16 %v2598_v5 }
 0x1c5   : > { %2054 = vmatprep.subr.bf16.mxu0 %v2465_v0  ;;  %2160 = vmatprep.subr.bf16.mxu1 %v2465_v0  ;;  %v2379_v28 = vld [vmem:[#allocation4 + $0x260] sm:$0xff]  }
 0x1c6   : > { %v1493_v2 = vpop.permute.xlu0 %1492  ;;  %v2725_v3 = vsel %vm334_vm3, %v784_v60, %v785_v59  ;;  %v340_v59 = vunpack.c.h.bf16 %v2598_v5  ;;  %v2380_v60 = vld [vmem:[#allocation4 + $0x110] sm:$0xff]   ;;  %v2382_v5 = vld [vmem:[#allocation4 + $0x118] sm:$0xff]  }
 0x1c7   : > { %v1499_v4 = vsel %vm413_vm10, %v1497_v61, %v1493_v2  ;;  %v2381_v61 = vld [vmem:[#allocation4 + $0x268] sm:$0xff]  }
 0x1c8   : > { %v1501_v6 = vsel %vm416_vm11, %v1499_v4, %v1495_v1  ;;  %2055 = vmatpush3.bf16.msra.mxu0 %v2334_v62  ;;  %2161 = vmatpush3.bf16.msra.mxu1 %v2335_v63  ;;  %v344_v62 = vrot.slane %v339_v58, 7  ;;  %v345_v63 = vrot.slane %v340_v59, 7  ;;  %v2383_v1 = vld [vmem:[#allocation4 + $0x270] sm:$0xff]  }
 0x1c9   : > { %v1521_v9 = vrot.slane %v1501_v6, 2  ;;  %2056 = vmatprep.subr.bf16.mxu0 %v2465_v0  ;;  %2162 = vmatprep.subr.bf16.mxu1 %v2465_v0 }
 0x1ca   : > { %v346_v2 = vsel %vm343_vm14, %v344_v62, %v345_v63  ;;  %v351_v4 = vsel %vm343_vm14, %v345_v63, -inf }
 0x1cb   : > { %v2734_v13 = vsel %vm364_vm12, %v1520_v10, %v1521_v9  ;;  %v2384_v9 = vld [vmem:[#allocation4 + $0x120] sm:$0xff]   ;;  %v2385_v10 = vld [vmem:[#allocation4 + $0x278] sm:$0xff]  }
 0x1cc   : > { %2057 = vmatpush3.bf16.msra.mxu0 %v2336_v7  ;;  %2163 = vmatpush3.bf16.msra.mxu1 %v2337_v8  ;;  %v358_v7 = vrot.slane %v351_v4, 1  ;;  %v356_v8 = vrot.slane %v346_v2, 1 }
 0x1cd   : > { %2058 = vmatprep.subr.bf16.mxu0 %v2465_v0  ;;  %2168 = vmatprep.subr.bf16.mxu1 %v2465_v0 }
 0x1cf   : > { %2165 = vmatmul.mubr.bf16.vlgmr.msra.gmra.mrb[0].mxu1 %v1157_v18  ;;  %v359_v18 = vsel %vm354_vm6, %v356_v8, %v358_v7 }
 0x1d0   : > { %2059 = vmatpush3.bf16.msra.mxu0 %v2338_v16  ;;  %2169 = vmatpush3.bf16.msra.mxu1 %v2339_v17  ;;  %v368_v16 = vrot.slane %v351_v4, 2 }
 0x1d1   : > { %2060 = vmatprep.subr.bf16.mxu0 %v2465_v0  ;;  %2170 = vmatprep.subr.bf16.mxu1 %v2465_v0 }
 0x1d2   : > { %2184 = vmatprep.mubr.msk.bf16.mxu1 %vm2466_vm0, %v2465_v0 }
 0x1d4   : > { %2061 = vmatpush3.bf16.msra.mxu0 %v2340_v19  ;;  %2171 = vmatpush3.bf16.msra.mxu1 %v2341_v20  ;;  %v366_v19 = vrot.slane %v346_v2, 2  ;;  %v2386_v20 = vld [vmem:[#allocation4 + $0x128] sm:$0xff]  }
 0x1d5   : > { %2062 = vmatprep.subr.bf16.mxu0 %v2465_v0  ;;  %2172 = vmatprep.subr.bf16.mxu1 %v2465_v0 }
 0x1d8   : > { %2063 = vmatpush3.bf16.msra.mxu0 %v2342_v11  ;;  %2173 = vmatpush3.bf16.msra.mxu1 %v2343_v21  ;;  %v1620_v11 = vsel %vm279_vm1, %v1615_v12, 0 }
 0x1d9   : > { %2068 = vmatprep.subr.bf16.mxu0 %v2465_v0  ;;  %2174 = vmatprep.subr.bf16.mxu1 %v2465_v0 }
 0x1db   : > { %2065 = vmatmul.mubr.bf16.vlgmr.msra.gmra.mrb[4].mxu0 %v2694_v35  ;;  %v2355_v35 = vld [vmem:[#allocation4 + $0x200] sm:$0xff]  }
 0x1dc   : > { %2069 = vmatpush3.bf16.msra.mxu0 %v2344_v22  ;;  %2175 = vmatpush3.bf16.msra.mxu1 %v2345_v23  ;;  %v363_v22 = vmax.f32 %v346_v2, %v359_v18 }
 0x1dd   : > { %2070 = vmatprep.subr.bf16.mxu0 %v2465_v0  ;;  %2176 = vmatprep.subr.bf16.mxu1 %v2465_v0 }
 0x1de   : > { %2084 = vmatprep.mubr.msk.bf16.mxu0 %vm2466_vm0, %v2465_v0 }
 0x1e0   : > { %2071 = vmatpush3.bf16.msra.mxu0 %v2346_v24  ;;  %2177 = vmatpush3.bf16.msra.mxu1 %v2347_v25  ;;  %v369_v24 = vsel %vm364_vm12, %v366_v19, %v368_v16  ;;  %v2387_v25 = vld [vmem:[#allocation4 + $0x130] sm:$0xff]  }
 0x1e1   : > { %2072 = vmatprep.subr.bf16.mxu0 %v2465_v0  ;;  %2178 = vmatprep.subr.bf16.mxu1 %v2465_v0 }
 0x1e4   : > { %2073 = vmatpush3.bf16.msra.mxu0 %v2348_v26  ;;  %2179 = vmatpush3.bf16.msra.mxu1 %v2349_v29  ;;  %v373_v29 = vmax.f32 %v363_v22, %v369_v24 }
 0x1e5   : > { %2074 = vmatprep.subr.bf16.mxu0 %v2465_v0  ;;  %2180 = vmatprep.subr.bf16.mxu1 %v2465_v0 }
 0x1e8   : > { %2075 = vmatpush3.bf16.msra.mxu0 %v2350_v30  ;;  %2181 = vmatpush3.bf16.msra.mxu1 %v2351_v31  ;;  %v2388_v30 = vld [vmem:[#allocation4 + $0x138] sm:$0xff]  }
 0x1e9   : > { %2076 = vmatprep.subr.bf16.mxu0 %v2465_v0  ;;  %2182 = vmatprep.subr.bf16.mxu1 %v2465_v0 }
 0x1ec   : > { %2077 = vmatpush3.bf16.msra.mxu0 %v2352_v32  ;;  %2183 = vmatpush3.bf16.msra.mxu1 %v2353_v33 }
 0x1ed   : > { %2078 = vmatprep.subr.bf16.mxu0 %v2465_v0  ;;  %2188 = vmatprep.subr.bf16.mxu1 %v2465_v0 }
 0x1ef   : > { %2185 = vmatmul.mubr.bf16.vlgmr.msra.gmra.mrb[0].mxu1 %v2712_v52  ;;  %v2373_v52 = vld [vmem:[#allocation4 + $0x248] sm:$0xff]  }
 0x1f0   : > { %2079 = vmatpush3.bf16.msra.mxu0 %v2354_v34  ;;  %2189 = vmatpush3.bf16.msra.mxu1 %v2355_v35 }
 0x1f1   : > { %2080 = vmatprep.subr.bf16.mxu0 %v2465_v0  ;;  %2190 = vmatprep.subr.bf16.mxu1 %v2465_v0 }
 0x1f2   : > { %2204 = vmatprep.mubr.msk.bf16.mxu1 %vm2466_vm0, %v2465_v0 }
 0x1f4   : > { %2081 = vmatpush3.bf16.msra.mxu0 %v2356_v36  ;;  %2191 = vmatpush3.bf16.msra.mxu1 %v2357_v37 }
 0x1f5   : > { %2082 = vmatprep.subr.bf16.mxu0 %v2465_v0  ;;  %2192 = vmatprep.subr.bf16.mxu1 %v2465_v0 }
 0x1f8   : > { %2083 = vmatpush3.bf16.msra.mxu0 %v2358_v27  ;;  %2193 = vmatpush3.bf16.msra.mxu1 %v2359_v38 }
 0x1f9   : > { %2088 = vmatprep.subr.bf16.mxu0 %v2465_v0  ;;  %2194 = vmatprep.subr.bf16.mxu1 %v2465_v0 }
 0x1fb   : > { %2085 = vmatmul.mubr.bf16.vlgmr.msra.gmra.mrb[4].mxu0 %v2701_v43  ;;  %v2366_v43 = vld [vmem:[#allocation4 + $0xd8] sm:$0xff]  }
 0x1fc   : > { %2089 = vmatpush3.bf16.msra.mxu0 %v2360_v39  ;;  %2195 = vmatpush3.bf16.msra.mxu1 %v2361_v40 }
 0x1fd   : > { %2090 = vmatprep.subr.bf16.mxu0 %v2465_v0  ;;  %2196 = vmatprep.subr.bf16.mxu1 %v2465_v0 }
 0x1fe   : > { %2104 = vmatprep.mubr.msk.bf16.mxu0 %vm2466_vm0, %v2465_v0 }
 0x200   : > { %2091 = vmatpush3.bf16.msra.mxu0 %v2362_v41  ;;  %2197 = vmatpush3.bf16.msra.mxu1 %v2363_v42 }
 0x201   : > { %2092 = vmatprep.subr.bf16.mxu0 %v2465_v0  ;;  %2198 = vmatprep.subr.bf16.mxu1 %v2465_v0 }
 0x204   : > { %2093 = vmatpush3.bf16.msra.mxu0 %v2364_v44  ;;  %2199 = vmatpush3.bf16.msra.mxu1 %v2365_v45 }
 0x205   : > { %2094 = vmatprep.subr.bf16.mxu0 %v2465_v0  ;;  %2200 = vmatprep.subr.bf16.mxu1 %v2465_v0 }
 0x208   : > { %2095 = vmatpush3.bf16.msra.mxu0 %v2366_v43  ;;  %2201 = vmatpush3.bf16.msra.mxu1 %v2367_v46 }
 0x209   : > { %2096 = vmatprep.subr.bf16.mxu0 %v2465_v0  ;;  %2202 = vmatprep.subr.bf16.mxu1 %v2465_v0 }
 0x20c   : > { %2097 = vmatpush3.bf16.msra.mxu0 %v2368_v47  ;;  %2203 = vmatpush3.bf16.msra.mxu1 %v2369_v48 }
 0x20d   : > { %2098 = vmatprep.subr.bf16.mxu0 %v2465_v0  ;;  %2208 = vmatprep.subr.bf16.mxu1 %v2465_v0 }
 0x20f   : > { %2205 = vmatmul.mubr.bf16.vlgmr.msra.gmra.mrb[0].mxu1 %v2716_v57  ;;  %v2378_v57 = vld [vmem:[#allocation4 + $0x108] sm:$0xff]  }
 0x210   : > { %2099 = vmatpush3.bf16.msra.mxu0 %v2370_v49  ;;  %2209 = vmatpush3.bf16.msra.mxu1 %v2371_v50 }
 0x211   : > { %2100 = vmatprep.subr.bf16.mxu0 %v2465_v0  ;;  %2210 = vmatprep.subr.bf16.mxu1 %v2465_v0 }
 0x212   : > { %2224 = vmatprep.mubr.msk.bf16.mxu1 %vm2466_vm0, %v2465_v0 }
 0x214   : > { %2101 = vmatpush3.bf16.msra.mxu0 %v2372_v51  ;;  %2211 = vmatpush3.bf16.msra.mxu1 %v2373_v52 }
 0x215   : > { %2102 = vmatprep.subr.bf16.mxu0 %v2465_v0  ;;  %2212 = vmatprep.subr.bf16.mxu1 %v2465_v0 }
 0x218   : > { %2103 = vmatpush3.bf16.msra.mxu0 %v2374_v53  ;;  %2213 = vmatpush3.bf16.msra.mxu1 %v2375_v54 }
 0x219   : > { %2108 = vmatprep.subr.bf16.mxu0 %v2465_v0  ;;  %2214 = vmatprep.subr.bf16.mxu1 %v2465_v0 }
 0x21b   : > { %2105 = vmatmul.mubr.bf16.vlgmr.msra.gmra.mrb[4].mxu0 %v2725_v3  ;;  %v350_v3 = vsel %vm343_vm14, -inf, %v344_v62 }
 0x21c   : > { %2109 = vmatpush3.bf16.msra.mxu0 %v2376_v55  ;;  %2215 = vmatpush3.bf16.msra.mxu1 %v2377_v56  ;;  %v355_v6 = vrot.slane %v350_v3, 1  ;;  %v365_v14 = vrot.slane %v350_v3, 2 }
 0x21d   : > { %2110 = vmatprep.subr.bf16.mxu0 %v2465_v0  ;;  %2216 = vmatprep.subr.bf16.mxu1 %v2465_v0 }
 0x21e   : > { %2124 = vmatprep.mubr.msk.bf16.mxu0 %vm2466_vm0, %v2465_v0  ;;  %v357_v17 = vsel %vm354_vm6, %v355_v6, %v356_v8  ;;  %v367_v23 = vsel %vm364_vm12, %v365_v14, %v366_v19 }
 0x21f   : > { %v362_v21 = vmax.f32 %v350_v3, %v357_v17 }
 0x220   : > { %2111 = vmatpush3.bf16.msra.mxu0 %v2378_v57  ;;  %2217 = vmatpush3.bf16.msra.mxu1 %v2379_v28 }
 0x221   : > { %2112 = vmatprep.subr.bf16.mxu0 %v2465_v0  ;;  %2218 = vmatprep.subr.bf16.mxu1 %v2465_v0  ;;  %v372_v26 = vmax.f32 %v362_v21, %v367_v23 }
 0x224   : > { %2113 = vmatpush3.bf16.msra.mxu0 %v2380_v60  ;;  %2219 = vmatpush3.bf16.msra.mxu1 %v2381_v61 }
 0x225   : > { %2114 = vmatprep.subr.bf16.mxu0 %v2465_v0  ;;  %2220 = vmatprep.subr.bf16.mxu1 %v2465_v0 }
 0x228   : > { %2115 = vmatpush3.bf16.msra.mxu0 %v2382_v5  ;;  %2221 = vmatpush3.bf16.msra.mxu1 %v2383_v1 }
 0x229   : > { %2116 = vmatprep.subr.bf16.mxu0 %v2465_v0  ;;  %2222 = vmatprep.subr.bf16.mxu1 %v2465_v0 }
 0x22c   : > { %2117 = vmatpush3.bf16.msra.mxu0 %v2384_v9  ;;  %2223 = vmatpush3.bf16.msra.mxu1 %v2385_v10 }
 0x22d   : > { %2118 = vmatprep.subr.bf16.mxu0 %v2465_v0  ;;  %2228 = vmatprep.subr.bf16.mxu1 %v2465_v0 }
 0x22f   : > { %2225 = vmatmul.mubr.bf16.vlgmr.msra.gmra.mrb[0].mxu1 %v2734_v13  ;;  %v374_v13 = vpack.c.bf16 %v373_v29, %v372_v26 }
 0x230   : > { %2119 = vmatpush3.bf16.msra.mxu0 %v2386_v20  ;;  %2229 = vmatpush3.bf16.msra.mxu1 %v1620_v11 }
 0x231   : > { %2120 = vmatprep.subr.bf16.mxu0 %v2465_v0  ;;  %2230 = vmatprep.mubr.msk.bf16.mxu1 %vm2466_vm0, %v2465_v0 }
 0x234   : > { %2121 = vmatpush3.bf16.msra.mxu0 %v2387_v25 }
 0x235   : > { %2122 = vmatprep.subr.bf16.mxu0 %v2465_v0 }
 0x238   : > { %2123 = vmatpush3.bf16.msra.mxu0 %v2388_v30 }
 0x23b   : > { %2125 = vmatmul.mubr.bf16.vlgmr.msra.gmra.mrb[4].mxu0 %v2678_v15  ;;  %2231 = vmatmul.mubr.msk.bf16.vlgmr.msra.gmra.mrb[0].mxu1 %vm275_vm2, %v374_v13 }
 0x30e   : > { %v1004_v31 = vpop.f32.mrb[4].mxu0  ;;  %v1656_v32 = vpop.f32.mrb[0].mxu1 }
 0x30f   : > { %v2234_v33 = vadd.f32 %v1656_v32, %v1004_v31  ;;  %v2126_v34 = vpop.f32.mrb[5].mxu0  ;;  %v2232_v35 = vpop.f32.mrb[1].mxu1 }
 0x310   : > { %v1007_v36 = vpop.f32.mrb[6].mxu0  ;;  %v1659_v37 = vpop.f32.mrb[2].mxu1 }
 0x311   : > { %v2235_v27 = vadd.f32 %v1659_v37, %v1007_v36  ;;  %v2127_v38 = vpop.f32.mrb[7].mxu0  ;;  %v2233_v39 = vpop.f32.mrb[3].mxu1  ;;  %v1673_v0 = vmul.f32 %v2234_v33, %v2234_v33 }
 0x313   : > { %v1665_v15 = vadd.f32 %v2235_v27, %v2234_v33  ;;  %v1674_v40 = vmul.f32 %v2235_v27, %v2235_v27  ;;  %v1926_v41 = vpack.c.bf16 %v2235_v27, %v2234_v33 }
 0x315   : > { %v1666_v42 = vrot.slane %v1665_v15, 4  ;;  %v1675_v44 = vadd.f32 %v1674_v40, %v1673_v0  ;;  %1927 = vst [vmem:[%s263_s10] sm:$0xff] %v1926_v41  }
 0x317   : > { %v1667_v45 = vadd.f32 %v1666_v42, %v1665_v15  ;;  %v1676_v43 = vrot.slane %v1675_v44, 4 }
 0x319   : > { %v1668_v46 = vrot.slane %v1667_v45, 2  ;;  %v1677_v47 = vadd.f32 %v1676_v43, %v1675_v44 }
 0x31b   : > { %v1669_v48 = vadd.f32 %v1668_v46, %v1667_v45  ;;  %v1678_v49 = vrot.slane %v1677_v47, 2 }
 0x31d   : > { %v1670_v50 = vrot.slane %v1669_v48, 1  ;;  %v1679_v51 = vadd.f32 %v1678_v49, %v1677_v47 }
 0x31f   : > { %v1671_v52 = vadd.f32 %v1670_v50, %v1669_v48  ;;  %v1680_v53 = vrot.slane %v1679_v51, 1 }
 0x321   : > { %1672 = vst [vmem:[%s266_s13] sm:$0x1] %v1671_v52  ;;  %v1681_v54 = vadd.f32 %v1680_v53, %v1679_v51 }
 0x323   : > { %1682 = vst [vmem:[%s269_s16] sm:$0x1] %v1681_v54 }
 0x324 PF: > { %s18_s18 = sadd.s32 1, %s2459_s18  }
 0x325   : > { %p15_p5 = scmp.ge.s32.totalorder %s18_s18, 4  }
 0x327   :  { %17 = sbr.rel (!%p15_p5) target bundleno = 2 (0x2), region = 95 }
 0x32e   :  { %1738 = vsyncpa [#allocation3], 1 }
 0x32f   :  { %1740 = vsyncpa [#allocation3 + $0x1], 1 }
 0x330   :  { %1741 = vsyncpa [#allocation5], 1 }

// kernel: inception_time_forward.5
= control target key start
LH: loop header
LB: loop body
LE: loop exit
PB: predicated region body
PF: predicated region fallthrough
CT: control target
= control target key end

     0   :  { %s2632_s24 = smov 0   ;;  %s3214_s0 = inlined_call_operand.vmem [shape: bf16[2,16,128], index: 0, kind: input, shape index: {}]   ;;  %s3215_s1 = inlined_call_operand.vmem [shape: f32[1,128], index: 1, kind: input, shape index: {}]   ;;  %s3216_s2 = inlined_call_operand.vmem [shape: f32[1,128], index: 2, kind: input, shape index: {}]   ;;  %s3217_s3 = inlined_call_operand.vmem [shape: bf16[128,32], index: 3, kind: input, shape index: {}]   ;;  %s3218_s4 = inlined_call_operand.vmem [shape: bf16[1408,128], index: 4, kind: input, shape index: {}]   ;;  %s3219_s5 = inlined_call_operand.vmem [shape: bf16[2,16,128], index: 5, kind: output, shape index: {0}]   ;;  %s3220_s6 = inlined_call_operand.vmem [shape: f32[2,1,128], index: 6, kind: output, shape index: {1}]   ;;  %s3221_s7 = inlined_call_operand.vmem [shape: f32[2,1,128], index: 7, kind: output, shape index: {2}]  }
   0x1 LB: > { %s1958_s25 = sadd.s32 4294967295, %s2584_s24   ;;  %p1962_p0 = scmp.ge.s32.totalorder %s2584_s24, 1  ;;  %s2584_s24 = sphi %s2632_s24, %s18_s24  }
   0x2   : > { %p242_p1 = scmp.lt.s32.totalorder %s2584_s24, 3 }
   0x4   : > { %p243_p2 = pnand %p1962_p0, %p242_p1 }
   0x5   : > { %v2482_v0 = vld [vmem:[%s3217_s3] sm:$0xff] (!%p243_p2)   ;;  %v2586_v1 = vmov (!%p243_p2), 0.0   ;;  %v2483_v2 = vld [vmem:[%s3217_s3 + $0x8] sm:$0xff] (!%p243_p2)   ;;  %vm2587_vm0 = vmmov (!%p243_p2), 0   ;;  %p280_p3 = scmp.lt.s32.totalorder (!%p243_p2), %s1958_s25, 1  ;;  %v2484_v3 = vld [vmem:[%s3217_s3 + $0x10] sm:$0xff] (!%p243_p2)  }
   0x6   : > { %246 = sbr.rel (%p243_p2) target bundleno = 787 (0x313), region = 40  ;;  %2190 = vmatprep.subr.bf16.mxu0 (!%p243_p2), %v2586_v1  ;;  %2310 = vmatprep.subr.bf16.mxu1 (!%p243_p2), %v2586_v1  ;;  %v2485_v4 = vld [vmem:[%s3217_s3 + $0x18] sm:$0xff] (!%p243_p2)   ;;  %v2486_v6 = vld [vmem:[%s3217_s3 + $0x20] sm:$0xff] (!%p243_p2)   ;;  %v2487_v10 = vld [vmem:[%s3217_s3 + $0x28] sm:$0xff] (!%p243_p2)   ;;  %vm437_vm1 = vcmask (!%p243_p2), 1041408   ;;  %s2588_s13 = smov (!%p243_p2), 64  }
   0x7   : > { %2191 = vmatpush3.bf16.msra.mxu0 (!%p243_p2), %v2482_v0  ;;  %2206 = vmatprep.mubr.msk.bf16.mxu0 (!%p243_p2), %vm2587_vm0, %v2586_v1  ;;  %v1967_v7 = vld [vmem:[%s3215_s1] ss:$0 sm:$0xff] (!%p243_p2)  ;;  %v2488_v14 = vld [vmem:[%s3217_s3 + $0x30] sm:$0xff] (!%p243_p2)   ;;  %v2489_v17 = vld [vmem:[%s3217_s3 + $0x38] sm:$0xff] (!%p243_p2)   ;;  %vm438_vm2 = vsmask.f32 (!%p243_p2), 1280 }
   0x8   : > { %2192 = vmatprep.subr.bf16.mxu0 (!%p243_p2), %v2586_v1  ;;  %2326 = vmatprep.mubr.msk.bf16.mxu1 (!%p243_p2), %vm2587_vm0, %v2586_v1  ;;  %v1968_v11 = vld [vmem:[%s3216_s2] ss:$0 sm:$0xff] (!%p243_p2)  ;;  %v2491_v23 = vld [vmem:[%s3218_s4 + $0x148] sm:$0xff] (!%p243_p2)   ;;  %v2492_v24 = vld [vmem:[%s3218_s4 + $0x150] sm:$0xff] (!%p243_p2)   ;;  %vm457_vm4 = vcmask (!%p243_p2), 1046528   ;;  %s2589_s16 = smov (!%p243_p2), 32  }
   0x9   : > { %v2490_v21 = vld [vmem:[%s3218_s4 + $0x140] sm:$0xff] (!%p243_p2)   ;;  %v2494_v25 = vld [vmem:[%s3218_s4 + $0x158] sm:$0xff] (!%p243_p2)   ;;  %v2495_v27 = vld [vmem:[%s3218_s4 + $0x48] sm:$0xff] (!%p243_p2)   ;;  %vm478_vm5 = vsmask.f32 (!%p243_p2), 7424  ;;  %s2590_s19 = smov (!%p243_p2), 96  }
   0xa   : > { %v2493_v22 = vld [vmem:[%s3218_s4 + $0x40] sm:$0xff] (!%p243_p2)   ;;  %2311 = vmatpush3.bf16.msra.mxu1 (!%p243_p2), %v2490_v21  ;;  %v2497_v35 = vld [vmem:[%s3218_s4 + $0x50] sm:$0xff] (!%p243_p2)   ;;  %v2498_v36 = vld [vmem:[%s3218_s4 + $0x168] sm:$0xff] (!%p243_p2)   ;;  %vm501_vm6 = vsmask.f32 (!%p243_p2), 6400  ;;  %vm513_vm7 = vcmask (!%p243_p2), 261120  }
   0xb   : > { %2193 = vmatpush3.bf16.msra.mxu0 (!%p243_p2), %v2483_v2  ;;  %2312 = vmatprep.subr.bf16.mxu1 (!%p243_p2), %v2586_v1  ;;  %v2496_v28 = vld [vmem:[%s3218_s4 + $0x160] sm:$0xff] (!%p243_p2)   ;;  %vm439_vm3 = vmand (!%p243_p2), %vm437_vm1, %vm438_vm2  ;;  %v2499_v40 = vld [vmem:[%s3218_s4 + $0x58] sm:$0xff] (!%p243_p2)   ;;  %vm516_vm8 = vcmask (!%p243_p2), 523264   ;;  %vm519_vm9 = vcmask (!%p243_p2), 785408   ;;  %vm467_vm10 = vcmask (!%p243_p2), 1045504   ;;  %vm769_vm11 = vcmask (!%p243_p2), 1043456  }
   0xc   : > { %2194 = vmatprep.subr.bf16.mxu0 (!%p243_p2), %v2586_v1  ;;  %v2500_v41 = vld [vmem:[%s3218_s4 + $0x170] sm:$0xff] (!%p243_p2)   ;;  %v2501_v50 = vld [vmem:[%s3218_s4 + $0x60] sm:$0xff] (!%p243_p2)   ;;  %v2502_v51 = vld [vmem:[%s3218_s4 + $0x178] sm:$0xff] (!%p243_p2)   ;;  %vm446_vm12 = vcmask (!%p243_p2), 1040384  }
   0xd   : > { %s3223_s25 = smov (!%p280_p3, %s1958_s25), 1  ;;  %v2503_v61 = vld [vmem:[%s3218_s4 + $0x68] sm:$0xff]   ;;  %v2505_v2 = vld [vmem:[%s3218_s4 + $0x70] sm:$0xff]  }
   0xe   : > { %s2069_s9 = sshll.u32 %s3223_s25, 3  ;;  %2313 = vmatpush3.bf16.msra.mxu1 %v2491_v23 }
   0xf   : > { %s284_s12 = scalar_lea.vmem %s3214_s0, %s2069_s9  ;;  %2195 = vmatpush3.bf16.msra.mxu0 %v2484_v3  ;;  %2314 = vmatprep.subr.bf16.mxu1 %v2586_v1  ;;  %s289_s30 = scalar_lea.vmem %s3219_s5, %s2069_s9 }
  0x10   : > { %v2074_v5 = vld [vmem:[%s284_s12] sm:$0xff]   ;;  %2196 = vmatprep.subr.bf16.mxu0 %v2586_v1  ;;  %s292_s9 = scalar_lea.vmem %s3220_s6, %s3223_s25 }
  0x11   : > { %v2075_v8 = vunpack.c.l.bf16 %v2074_v5  ;;  %v2076_v9 = vunpack.c.h.bf16 %v2074_v5  ;;  %v2591_v5 = vmov 0  }
  0x12   : > { %2315 = vmatpush3.bf16.msra.mxu1 %v2492_v24 }
  0x13   : > { %2197 = vmatpush3.bf16.msra.mxu0 %v2485_v4  ;;  %v308_v12 = vmul.f32 %v2075_v8, %v1967_v7  ;;  %v309_v13 = vmul.f32 %v2076_v9, %v1967_v7  ;;  %2316 = vmatprep.subr.bf16.mxu1 %v2586_v1  ;;  %v2507_v4 = vld [vmem:[%s3218_s4 + $0x78] sm:$0xff]   ;;  %v503_v8 = vrot.slane %v2591_v5, 2 }
  0x14   : > { %2198 = vmatprep.subr.bf16.mxu0 %v2586_v1 }
  0x15   : > { %v317_v15 = vadd.f32 %v1968_v11, %v308_v12  ;;  %v318_v16 = vadd.f32 %v1968_v11, %v309_v13 }
  0x16   : > { %2317 = vmatpush3.bf16.msra.mxu1 %v2494_v25 }
  0x17   : > { %2199 = vmatpush3.bf16.msra.mxu0 %v2486_v6  ;;  %v319_v18 = vmax.f32 %v317_v15, 0.0  ;;  %v320_v19 = vmax.f32 %v318_v16, 0.0  ;;  %2318 = vmatprep.subr.bf16.mxu1 %v2586_v1  ;;  %v484_v6 = vrot.slane %v2591_v5, 1 }
  0x18   : > { %2200 = vmatprep.subr.bf16.mxu0 %v2586_v1 }
  0x19   : > { %v2691_v20 = vpack.c.bf16 %v320_v19, %v319_v18 }
  0x1a   : > { %2319 = vmatpush3.bf16.msra.mxu1 %v2496_v28 }
  0x1b   : > { %2201 = vmatpush3.bf16.msra.mxu0 %v2487_v10  ;;  %2320 = vmatprep.subr.bf16.mxu1 %v2586_v1  ;;  %v504_v10 = vor.u32 %v503_v8, %v484_v6 }
  0x1c   : > { %2202 = vmatprep.subr.bf16.mxu0 %v2586_v1 }
  0x1e   : > { %2321 = vmatpush3.bf16.msra.mxu1 %v2498_v36 }
  0x1f   : > { %2203 = vmatpush3.bf16.msra.mxu0 %v2488_v14  ;;  %2322 = vmatprep.subr.bf16.mxu1 %v2586_v1 }
  0x20   : > { %2204 = vmatprep.subr.bf16.mxu0 %v2586_v1 }
  0x22   : > { %2323 = vmatpush3.bf16.msra.mxu1 %v2500_v41 }
  0x23   : > { %2205 = vmatpush3.bf16.msra.mxu0 %v2489_v17  ;;  %2324 = vmatprep.subr.bf16.mxu1 %v2586_v1 }
  0x24   : > { %2210 = vmatprep.subr.bf16.mxu0 %v2586_v1 }
  0x26   : > { %2207 = vmatmul.mubr.bf16.vlgmr.msra.gmra.mrb[0].mxu0 %v2691_v20  ;;  %2325 = vmatpush3.bf16.msra.mxu1 %v2502_v51 }
  0x27   : > { %2226 = vmatprep.mubr.msk.bf16.mxu0 %vm2587_vm0, %v2586_v1  ;;  %2211 = vmatpush3.bf16.msra.mxu0 %v2493_v22 }
  0x28   : > { %2212 = vmatprep.subr.bf16.mxu0 %v2586_v1  ;;  %2330 = vmatprep.subr.bf16.mxu1 %v2586_v1 }
  0x2b   : > { %2213 = vmatpush3.bf16.msra.mxu0 %v2495_v27 }
  0x2c   : > { %2214 = vmatprep.subr.bf16.mxu0 %v2586_v1 }
  0x2f   : > { %2215 = vmatpush3.bf16.msra.mxu0 %v2497_v35 }
  0x30   : > { %2216 = vmatprep.subr.bf16.mxu0 %v2586_v1 }
  0x33   : > { %2217 = vmatpush3.bf16.msra.mxu0 %v2499_v40 }
  0x34   : > { %2218 = vmatprep.subr.bf16.mxu0 %v2586_v1 }
  0x37   : > { %2219 = vmatpush3.bf16.msra.mxu0 %v2501_v50 }
  0x38   : > { %2220 = vmatprep.subr.bf16.mxu0 %v2586_v1 }
  0x3b   : > { %2221 = vmatpush3.bf16.msra.mxu0 %v2503_v61 }
  0x3c   : > { %2222 = vmatprep.subr.bf16.mxu0 %v2586_v1 }
  0x3f   : > { %2223 = vmatpush3.bf16.msra.mxu0 %v2505_v2  ;;  %v2511_v2 = vld [vmem:[%s3218_s4 + $0x8] sm:$0xff]  }
  0x40   : > { %2224 = vmatprep.subr.bf16.mxu0 %v2586_v1 }
  0x43   : > { %2225 = vmatpush3.bf16.msra.mxu0 %v2507_v4 }
  0x44   : > { %2230 = vmatprep.subr.bf16.mxu0 %v2586_v1 }
  0xf9   : > { %v420_v26 = vpop.f32.mrb[0].mxu0 }
  0xfa   : > { %v2208_v29 = vpop.f32.mrb[1].mxu0 }
  0xfb   : > { %v423_v30 = vpop.f32.mrb[2].mxu0 }
  0xfc   : > { %v427_v31 = vpack.c.bf16 %v423_v30, %v420_v26  ;;  %v2209_v32 = vpop.f32.mrb[3].mxu0 }
  0xfe   : > { %v429_v33 = vshrl.u32 %v427_v31, 16  ;;  %v432_v34 = vshll.u32 %v427_v31, 16 }
 0x100   : > { %v431_v37 = vrot.slane %v429_v33, 6  ;;  %v434_v38 = vrot.slane %v432_v34, 7  ;;  %v2504_v33 = vld [vmem:[%s3218_s4 + $0x180] sm:$0xff]  }
 0x102   : > { %v435_v39 = vor.u32 %v434_v38, %v431_v37  ;;  %v2506_v37 = vld [vmem:[%s3218_s4 + $0x188] sm:$0xff]  }
 0x104   : > { %v2740_v42 = vsel %vm439_vm3, 0, %v435_v39  ;;  %v2742_v43 = vsel %vm439_vm3, %v435_v39, 0 }
 0x105   : > { %v2745_v44 = vrot.slane %v2742_v43, 1  ;;  %v983_v45 = vshll.u32 %v2742_v43, 16  ;;  %v994_v46 = vshrl.u32 %v2742_v43, 16  ;;  %v497_v47 = vrot.slane %v2740_v42, 1 }
 0x106   : > { %v487_v48 = vshll.u32 %v2740_v42, 16  ;;  %v505_v49 = vshrl.u32 %v2740_v42, 16 }
 0x107   : > { %1119 = vrot.lane.b32.xlu1 %v2745_v44, %s2588_s13  ;;  %v985_v52 = vrot.slane %v983_v45, 1  ;;  %v996_v54 = vrot.slane %v994_v46, 1  ;;  %v997_v55 = vrot.slane %v983_v45, 2  ;;  %v991_v57 = vsel %vm457_vm4, %v497_v47, %v2745_v44 }
 0x108   : > { %v489_v53 = vrot.slane %v487_v48, 1  ;;  %v507_v58 = vrot.slane %v505_v49, 1  ;;  %v508_v60 = vrot.slane %v487_v48, 2  ;;  %v498_v9 = vsel %vm457_vm4, %v484_v6, %v497_v47 }
 0x109   : > { %v1116_v56 = vor.u32 %v994_v46, %v985_v52  ;;  %v998_v62 = vor.u32 %v997_v55, %v996_v54  ;;  %v1473_v15 = vsel %vm457_vm4, %v2745_v44, %v484_v6  ;;  %v2508_v44 = vld [vmem:[%s3218_s4 + $0x190] sm:$0xff]   ;;  %v2509_v54 = vld [vmem:[%s3218_s4] sm:$0xff]   ;;  %v2510_v55 = vld [vmem:[%s3218_s4 + $0x198] sm:$0xff]  }
 0x10a   : > { %v539_v59 = vor.u32 %v505_v49, %v489_v53  ;;  %v509_v0 = vor.u32 %v508_v60, %v507_v58  ;;  %v490_v7 = vsel %vm478_vm5, %v484_v6, %v489_v53 }
 0x10b   : > { %1117 = vrot.lane.b32.xlu0 %v1116_v56, %s2589_s16  ;;  %992 = vrot.lane.b32.xlu1 %v991_v57, %s2588_s13  ;;  %v1470_v11 = vsel %vm478_vm5, %v1116_v56, %v484_v6  ;;  %v1476_v13 = vsel %vm501_vm6, %v998_v62, %v504_v10  ;;  %v1353_v14 = vsel %vm501_vm6, %v507_v58, %v998_v62  ;;  %v442_v56 = vunpack.c.l.bf16 %v2691_v20 }
 0x10c   : > { %v986_v63 = vsel %vm478_vm5, %v539_v59, %v985_v52  ;;  %v999_v3 = vsel %vm501_vm6, %v509_v0, %v998_v62  ;;  %v510_v12 = vsel %vm501_vm6, %v504_v10, %v509_v0  ;;  %v865_v16 = vsel %vm501_vm6, %v484_v6, %v509_v0 }
 0x10d   : > { %v443_v57 = vunpack.c.h.bf16 %v2691_v20  ;;  %v2512_v20 = vld [vmem:[%s3218_s4 + $0x1a0] sm:$0xff]  }
 0x10f   : > { %1121 = vrot.lane.b32.xlu1 %v998_v62, %s2590_s19  ;;  %987 = vrot.lane.b32.xlu0 %v986_v63, %s2589_s16  ;;  %v448_v4 = vrot.slane %v443_v57, 7  ;;  %v2522_v57 = vld [vmem:[%s3218_s4 + $0x1c8] sm:$0xff]  }
 0x113   : > { %540 = vrot.lane.b32.xlu1 %v539_v59, %s2589_s16  ;;  %1000 = vrot.lane.b32.xlu0 %v999_v3, %s2590_s19  ;;  %v447_v3 = vrot.slane %v442_v56, 7  ;;  %v2521_v56 = vld [vmem:[%s3218_s4 + $0x30] sm:$0xff]  }
 0x117   : > { %542 = vrot.lane.b32.xlu1 %v497_v47, %s2588_s13  ;;  %491 = vrot.lane.b32.xlu0 %v490_v7, %s2589_s16 }
 0x11b   : > { %544 = vrot.lane.b32.xlu1 %v509_v0, %s2590_s19  ;;  %499 = vrot.lane.b32.xlu0 %v498_v9, %s2588_s13 }
 0x11f   : > { %1471 = vrot.lane.b32.xlu1 %v1470_v11, %s2589_s16  ;;  %511 = vrot.lane.b32.xlu0 %v510_v12, %s2590_s19  ;;  %v449_v12 = vsel %vm446_vm12, %v447_v3, %v448_v4 }
 0x123   : > { %1477 = vrot.lane.b32.xlu1 %v1476_v13, %s2590_s19  ;;  %1354 = vrot.lane.b32.xlu0 %v1353_v14, %s2590_s19  ;;  %v453_v13 = vsel %vm446_vm12, -inf, %v447_v3  ;;  %v454_v14 = vsel %vm446_vm12, %v448_v4, -inf  ;;  %v2532_v3 = vld [vmem:[%s3218_s4 + $0x1f0] sm:$0xff]   ;;  %v2533_v4 = vld [vmem:[%s3218_s4 + $0xa0] sm:$0xff]  }
 0x127   : > { %1474 = vrot.lane.b32.xlu0 %v1473_v15, %s2588_s13  ;;  %1595 = vrot.lane.b32.xlu1 %v484_v6, %s2588_s13  ;;  %s295_s13 = scalar_lea.vmem %s3221_s7, %s3223_s25 }
 0x12b   : > { %1593 = vrot.lane.b32.xlu0 %v484_v6, %s2589_s16  ;;  %1597 = vrot.lane.b32.xlu1 %v504_v10, %s2590_s19  ;;  %v2513_v10 = vld [vmem:[%s3218_s4 + $0x10] sm:$0xff]  }
 0x12f   : > { %866 = vrot.lane.b32.xlu0 %v865_v16, %s2590_s19 }
 0x179   : > { %v1120_v17 = vpop.permute.xlu1 %1119 }
 0x17d   : > { %v1118_v18 = vpop.permute.xlu0 %1117  ;;  %v993_v19 = vpop.permute.xlu1 %992 }
 0x17e   : > { %v1124_v21 = vsel %vm513_vm7, %v2742_v43, %v1118_v18 }
 0x17f   : > { %v1126_v25 = vsel %vm516_vm8, %v1124_v21, %v1120_v17  ;;  %v2516_v21 = vld [vmem:[%s3218_s4 + $0x1b0] sm:$0xff]  }
 0x181   : > { %v1122_v22 = vpop.permute.xlu1 %1121  ;;  %v988_v23 = vpop.permute.xlu0 %987 }
 0x182   : > { %v1003_v24 = vsel %vm513_vm7, %v2740_v42, %v988_v23  ;;  %v2814_v26 = vsel %vm519_vm9, %v1126_v25, %v1122_v22  ;;  %v458_v22 = vrot.slane %v453_v13, 1  ;;  %v459_v23 = vrot.slane %v449_v12, 1 }
 0x183   : > { %v1005_v28 = vsel %vm516_vm8, %v1003_v24, %v993_v19  ;;  %v1148_v31 = vrot.slane %v2814_v26, 2  ;;  %v1376_v63 = vrot.slane %v2814_v26, 6  ;;  %v2515_v19 = vld [vmem:[%s3218_s4 + $0x18] sm:$0xff]   ;;  %v461_v24 = vrot.slane %v454_v14, 1 }
 0x185   : > { %v541_v27 = vpop.permute.xlu1 %540  ;;  %v1001_v29 = vpop.permute.xlu0 %1000 }
 0x186   : > { %v2818_v30 = vsel %vm519_vm9, %v1005_v28, %v1001_v29  ;;  %v547_v40 = vsel %vm513_vm7, %v2740_v42, %v541_v27 }
 0x187   : > { %v1147_v32 = vrot.slane %v2818_v30, 2 }
 0x189   : > { %v543_v34 = vpop.permute.xlu1 %542  ;;  %v492_v35 = vpop.permute.xlu0 %491  ;;  %v1149_v36 = vsel %vm467_vm10, %v1147_v32, %v1148_v31  ;;  %v468_v31 = vrot.slane %v453_v13, 2  ;;  %v471_v32 = vrot.slane %v454_v14, 2  ;;  %v2543_v14 = vld [vmem:[%s3218_s4 + $0xc8] sm:$0xff]  }
 0x18a   : > { %2327 = vmatmul.mubr.bf16.vlgmr.msra.gmra.mrb[0].mxu1 %v1149_v36  ;;  %v549_v41 = vsel %vm516_vm8, %v547_v40, %v543_v34  ;;  %v515_v45 = vsel %vm513_vm7, 0, %v492_v35  ;;  %v2517_v36 = vld [vmem:[%s3218_s4 + $0x20] sm:$0xff]   ;;  %v462_v40 = vsel %vm457_vm4, %v459_v23, %v461_v24  ;;  %v2553_v24 = vld [vmem:[%s3218_s4 + $0xf0] sm:$0xff]  }
 0x18b   : > { %2331 = vmatpush3.bf16.msra.mxu1 %v2504_v33  ;;  %2346 = vmatprep.mubr.msk.bf16.mxu1 %vm2587_vm0, %v2586_v1 }
 0x18c   : > { %2332 = vmatprep.subr.bf16.mxu1 %v2586_v1 }
 0x18d   : > { %v545_v38 = vpop.permute.xlu1 %544  ;;  %v500_v39 = vpop.permute.xlu0 %499 }
 0x18e   : > { %v2840_v46 = vsel %vm519_vm9, %v549_v41, %v545_v38  ;;  %v2844_v47 = vsel %vm516_vm8, %v515_v45, %v500_v39  ;;  %v460_v39 = vsel %vm457_vm4, %v458_v22, %v459_v23  ;;  %v469_v41 = vrot.slane %v449_v12, 2  ;;  %v2551_v22 = vld [vmem:[%s3218_s4 + $0xe8] sm:$0xff]   ;;  %v2552_v23 = vld [vmem:[%s3218_s4 + $0x240] sm:$0xff]  }
 0x18f   : > { %2333 = vmatpush3.bf16.msra.mxu1 %v2506_v37  ;;  %v572_v50 = vrot.slane %v2840_v46, 2  ;;  %v771_v51 = vrot.slane %v2840_v46, 4  ;;  %v888_v34 = vrot.slane %v2840_v46, 6  ;;  %v2518_v37 = vld [vmem:[%s3218_s4 + $0x1b8] sm:$0xff]   ;;  %v465_v46 = vmax.f32 %v453_v13, %v460_v39 }
 0x190   : > { %2334 = vmatprep.subr.bf16.mxu1 %v2586_v1  ;;  %v2542_v13 = vld [vmem:[%s3218_s4 + $0x218] sm:$0xff]  }
 0x191   : > { %v1472_v48 = vpop.permute.xlu1 %1471  ;;  %v512_v49 = vpop.permute.xlu0 %511  ;;  %v2566_v39 = vld [vmem:[%s3218_s4 + $0x278] sm:$0xff]  }
 0x192   : > { %v2848_v42 = vsel %vm519_vm9, %v2844_v47, %v512_v49  ;;  %v1480_v5 = vsel %vm513_vm7, %v2742_v43, %v1472_v48  ;;  %v2514_v43 = vld [vmem:[%s3218_s4 + $0x1a8] sm:$0xff]   ;;  %v470_v48 = vsel %vm467_vm10, %v468_v31, %v469_v41  ;;  %v472_v49 = vsel %vm467_vm10, %v469_v41, %v471_v32  ;;  %v2560_v32 = vld [vmem:[%s3218_s4 + $0x260] sm:$0xff]  }
 0x193   : > { %v571_v52 = vrot.slane %v2848_v42, 2  ;;  %v770_v53 = vrot.slane %v2848_v42, 4  ;;  %2335 = vmatpush3.bf16.msra.mxu1 %v2508_v44  ;;  %v1258_v44 = vrot.slane %v2818_v30, 4  ;;  %v2559_v31 = vld [vmem:[%s3218_s4 + $0x108] sm:$0xff]   ;;  %v2568_v41 = vld [vmem:[%s3218_s4 + $0x280] sm:$0xff]  }
 0x194   : > { %2336 = vmatprep.subr.bf16.mxu1 %v2586_v1 }
 0x195   : > { %v1478_v58 = vpop.permute.xlu1 %1477  ;;  %v1355_v59 = vpop.permute.xlu0 %1354  ;;  %v573_v60 = vsel %vm467_vm10, %v571_v52, %v572_v50  ;;  %v2865_v61 = vsel %vm769_vm11, %v770_v53, %v771_v51  ;;  %v1259_v50 = vrot.slane %v2814_v26, 4  ;;  %v2519_v51 = vld [vmem:[%s3218_s4 + $0x28] sm:$0xff]   ;;  %v2520_v52 = vld [vmem:[%s3218_s4 + $0x1c0] sm:$0xff]   ;;  %v2937_v53 = vmax.f32 %v465_v46, %v470_v48  ;;  %v2572_v46 = vld [vmem:[%s3218_s4 + $0x290] sm:$0xff]  }
 0x196   : > { %v1357_v62 = vsel %vm519_vm9, %v1005_v28, %v1355_v59  ;;  %2227 = vmatmul.mubr.bf16.vlgmr.msra.gmra.mrb[4].mxu0 %v573_v60  ;;  %v2524_v59 = vld [vmem:[%s3218_s4 + $0x1d0] sm:$0xff]   ;;  %v2525_v60 = vld [vmem:[%s3218_s4 + $0x80] sm:$0xff]  }
 0x197   : > { %v1375_v0 = vrot.slane %v1357_v62, 6  ;;  %2231 = vmatpush3.bf16.msra.mxu0 %v2509_v54  ;;  %2337 = vmatpush3.bf16.msra.mxu1 %v2510_v55  ;;  %v1260_v26 = vsel %vm769_vm11, %v1258_v44, %v1259_v50  ;;  %v2526_v62 = vld [vmem:[%s3218_s4 + $0x1d8] sm:$0xff]   ;;  %v2569_v44 = vld [vmem:[%s3218_s4 + $0x130] sm:$0xff]   ;;  %v2574_v48 = vld [vmem:[%s3218_s4 + $0x2a0] sm:$0xff]  }
 0x198   : > { %2232 = vmatprep.subr.bf16.mxu0 %v2586_v1  ;;  %2338 = vmatprep.subr.bf16.mxu1 %v2586_v1  ;;  %v2576_v50 = vld [vmem:[%s3218_s4 + $0x2b0] sm:$0xff]  }
 0x199   : > { %v1475_v6 = vpop.permute.xlu0 %1474  ;;  %v1596_v7 = vpop.permute.xlu1 %1595  ;;  %2246 = vmatprep.mubr.msk.bf16.mxu0 %vm2587_vm0, %v2586_v1  ;;  %v2882_v8 = vsel %vm437_vm1, %v1375_v0, %v1376_v63  ;;  %v2527_v63 = vld [vmem:[%s3218_s4 + $0x88] sm:$0xff]   ;;  %v2528_v0 = vld [vmem:[%s3218_s4 + $0x1e0] sm:$0xff]  }
 0x19a   : > { %v1482_v9 = vsel %vm516_vm8, %v1480_v5, %v1475_v6  ;;  %v2534_v5 = vld [vmem:[%s3218_s4 + $0x1f8] sm:$0xff]   ;;  %v2535_v6 = vld [vmem:[%s3218_s4 + $0xa8] sm:$0xff]  }
 0x19b   : > { %2233 = vmatpush3.bf16.msra.mxu0 %v2511_v2  ;;  %2339 = vmatpush3.bf16.msra.mxu1 %v2512_v20  ;;  %v2892_v11 = vsel %vm519_vm9, %v1482_v9, %v1478_v58  ;;  %v2523_v58 = vld [vmem:[%s3218_s4 + $0x38] sm:$0xff]   ;;  %v2530_v2 = vld [vmem:[%s3218_s4 + $0x1e8] sm:$0xff]   ;;  %v2537_v9 = vld [vmem:[%s3218_s4 + $0xb0] sm:$0xff]  }
 0x19c   : > { %2234 = vmatprep.subr.bf16.mxu0 %v2586_v1  ;;  %2340 = vmatprep.subr.bf16.mxu1 %v2586_v1  ;;  %v1623_v29 = vrot.slane %v2892_v11, 2  ;;  %v2531_v20 = vld [vmem:[%s3218_s4 + $0x98] sm:$0xff]  }
 0x19d   : > { %v1594_v15 = vpop.permute.xlu0 %1593  ;;  %v1598_v16 = vpop.permute.xlu1 %1597 }
 0x19e   : > { %v1600_v17 = vsel %vm513_vm7, 0, %v1594_v15  ;;  %v2544_v15 = vld [vmem:[%s3218_s4 + $0x220] sm:$0xff]  }
 0x19f   : > { %v1602_v18 = vsel %vm516_vm8, %v1600_v17, %v1596_v7  ;;  %2235 = vmatpush3.bf16.msra.mxu0 %v2513_v10  ;;  %2341 = vmatpush3.bf16.msra.mxu1 %v2514_v43  ;;  %v2536_v7 = vld [vmem:[%s3218_s4 + $0x200] sm:$0xff]   ;;  %v2538_v10 = vld [vmem:[%s3218_s4 + $0x208] sm:$0xff]   ;;  %v2540_v43 = vld [vmem:[%s3218_s4 + $0x210] sm:$0xff]  }
 0x1a0   : > { %v1604_v25 = vsel %vm519_vm9, %v1602_v18, %v1598_v16  ;;  %2236 = vmatprep.subr.bf16.mxu0 %v2586_v1  ;;  %2342 = vmatprep.subr.bf16.mxu1 %v2586_v1  ;;  %v2546_v16 = vld [vmem:[%s3218_s4 + $0x228] sm:$0xff]   ;;  %v2547_v17 = vld [vmem:[%s3218_s4 + $0xd8] sm:$0xff]   ;;  %v2548_v18 = vld [vmem:[%s3218_s4 + $0x230] sm:$0xff]  }
 0x1a1   : > { %v1624_v27 = vrot.slane %v1604_v25, 2  ;;  %v867_v28 = vpop.permute.xlu0 %866  ;;  %v2554_v25 = vld [vmem:[%s3218_s4 + $0x248] sm:$0xff]  }
 0x1a2   : > { %v869_v33 = vsel %vm519_vm9, %v2844_v47, %v867_v28  ;;  %v466_v47 = vmax.f32 %v449_v12, %v462_v40  ;;  %v2541_v12 = vld [vmem:[%s3218_s4 + $0xc0] sm:$0xff]   ;;  %v2567_v40 = vld [vmem:[%s3218_s4 + $0x128] sm:$0xff]  }
 0x1a3   : > { %v887_v35 = vrot.slane %v869_v33, 6  ;;  %2237 = vmatpush3.bf16.msra.mxu0 %v2515_v19  ;;  %2343 = vmatpush3.bf16.msra.mxu1 %v2516_v21  ;;  %v2918_v38 = vsel %vm467_vm10, %v1623_v29, %v1624_v27  ;;  %v2549_v19 = vld [vmem:[%s3218_s4 + $0xe0] sm:$0xff]   ;;  %v2550_v21 = vld [vmem:[%s3218_s4 + $0x238] sm:$0xff]   ;;  %v2556_v27 = vld [vmem:[%s3218_s4 + $0x250] sm:$0xff]  }
 0x1a4   : > { %2238 = vmatprep.subr.bf16.mxu0 %v2586_v1  ;;  %2344 = vmatprep.subr.bf16.mxu1 %v2586_v1  ;;  %v2939_v54 = vmax.f32 %v466_v47, %v472_v49  ;;  %v2557_v28 = vld [vmem:[%s3218_s4 + $0x100] sm:$0xff]   ;;  %v2558_v29 = vld [vmem:[%s3218_s4 + $0x258] sm:$0xff]   ;;  %v2561_v33 = vld [vmem:[%s3218_s4 + $0x110] sm:$0xff]  }
 0x1a5   : > { %v2926_v45 = vsel %vm437_vm1, %v887_v35, %v888_v34  ;;  %v2562_v34 = vld [vmem:[%s3218_s4 + $0x268] sm:$0xff]   ;;  %v2563_v35 = vld [vmem:[%s3218_s4 + $0x118] sm:$0xff]  }
 0x1a6   : > { %v477_v55 = vpack.c.bf16 %v2939_v54, %v2937_v53  ;;  %v2573_v47 = vld [vmem:[%s3218_s4 + $0x298] sm:$0xff]   ;;  %v2575_v49 = vld [vmem:[%s3218_s4 + $0x2a8] sm:$0xff]  }
 0x1a7   : > { %2239 = vmatpush3.bf16.msra.mxu0 %v2517_v36  ;;  %2345 = vmatpush3.bf16.msra.mxu1 %v2518_v37  ;;  %v2564_v36 = vld [vmem:[%s3218_s4 + $0x270] sm:$0xff]   ;;  %v2565_v37 = vld [vmem:[%s3218_s4 + $0x120] sm:$0xff]  }
 0x1a8   : > { %2240 = vmatprep.subr.bf16.mxu0 %v2586_v1  ;;  %2350 = vmatprep.subr.bf16.mxu1 %v2586_v1 }
 0x1aa   : > { %2347 = vmatmul.mubr.bf16.vlgmr.msra.gmra.mrb[0].mxu1 %v1260_v26 }
 0x1ab   : > { %2241 = vmatpush3.bf16.msra.mxu0 %v2519_v51  ;;  %2351 = vmatpush3.bf16.msra.mxu1 %v2520_v52 }
 0x1ac   : > { %2242 = vmatprep.subr.bf16.mxu0 %v2586_v1  ;;  %2352 = vmatprep.subr.bf16.mxu1 %v2586_v1 }
 0x1ad   : > { %2366 = vmatprep.mubr.msk.bf16.mxu1 %vm2587_vm0, %v2586_v1 }
 0x1af   : > { %2243 = vmatpush3.bf16.msra.mxu0 %v2521_v56  ;;  %2353 = vmatpush3.bf16.msra.mxu1 %v2522_v57 }
 0x1b0   : > { %2244 = vmatprep.subr.bf16.mxu0 %v2586_v1  ;;  %2354 = vmatprep.subr.bf16.mxu1 %v2586_v1 }
 0x1b3   : > { %2245 = vmatpush3.bf16.msra.mxu0 %v2523_v58  ;;  %2355 = vmatpush3.bf16.msra.mxu1 %v2524_v59 }
 0x1b4   : > { %2250 = vmatprep.subr.bf16.mxu0 %v2586_v1  ;;  %2356 = vmatprep.subr.bf16.mxu1 %v2586_v1 }
 0x1b6   : > { %2247 = vmatmul.mubr.bf16.vlgmr.msra.gmra.mrb[4].mxu0 %v2848_v42  ;;  %v2529_v42 = vld [vmem:[%s3218_s4 + $0x90] sm:$0xff]  }
 0x1b7   : > { %2251 = vmatpush3.bf16.msra.mxu0 %v2525_v60  ;;  %2357 = vmatpush3.bf16.msra.mxu1 %v2526_v62 }
 0x1b8   : > { %2252 = vmatprep.subr.bf16.mxu0 %v2586_v1  ;;  %2358 = vmatprep.subr.bf16.mxu1 %v2586_v1 }
 0x1b9   : > { %2266 = vmatprep.mubr.msk.bf16.mxu0 %vm2587_vm0, %v2586_v1 }
 0x1bb   : > { %2253 = vmatpush3.bf16.msra.mxu0 %v2527_v63  ;;  %2359 = vmatpush3.bf16.msra.mxu1 %v2528_v0 }
 0x1bc   : > { %2254 = vmatprep.subr.bf16.mxu0 %v2586_v1  ;;  %2360 = vmatprep.subr.bf16.mxu1 %v2586_v1 }
 0x1bf   : > { %2255 = vmatpush3.bf16.msra.mxu0 %v2529_v42  ;;  %2361 = vmatpush3.bf16.msra.mxu1 %v2530_v2 }
 0x1c0   : > { %2256 = vmatprep.subr.bf16.mxu0 %v2586_v1  ;;  %2362 = vmatprep.subr.bf16.mxu1 %v2586_v1 }
 0x1c3   : > { %2257 = vmatpush3.bf16.msra.mxu0 %v2531_v20  ;;  %2363 = vmatpush3.bf16.msra.mxu1 %v2532_v3 }
 0x1c4   : > { %2258 = vmatprep.subr.bf16.mxu0 %v2586_v1  ;;  %2364 = vmatprep.subr.bf16.mxu1 %v2586_v1 }
 0x1c7   : > { %2259 = vmatpush3.bf16.msra.mxu0 %v2533_v4  ;;  %2365 = vmatpush3.bf16.msra.mxu1 %v2534_v5 }
 0x1c8   : > { %2260 = vmatprep.subr.bf16.mxu0 %v2586_v1  ;;  %2370 = vmatprep.subr.bf16.mxu1 %v2586_v1 }
 0x1ca   : > { %2367 = vmatmul.mubr.bf16.vlgmr.msra.gmra.mrb[0].mxu1 %v2882_v8  ;;  %v2539_v8 = vld [vmem:[%s3218_s4 + $0xb8] sm:$0xff]  }
 0x1cb   : > { %2261 = vmatpush3.bf16.msra.mxu0 %v2535_v6  ;;  %2371 = vmatpush3.bf16.msra.mxu1 %v2536_v7 }
 0x1cc   : > { %2262 = vmatprep.subr.bf16.mxu0 %v2586_v1  ;;  %2372 = vmatprep.subr.bf16.mxu1 %v2586_v1 }
 0x1cd   : > { %2386 = vmatprep.mubr.msk.bf16.mxu1 %vm2587_vm0, %v2586_v1 }
 0x1cf   : > { %2263 = vmatpush3.bf16.msra.mxu0 %v2537_v9  ;;  %2373 = vmatpush3.bf16.msra.mxu1 %v2538_v10 }
 0x1d0   : > { %2264 = vmatprep.subr.bf16.mxu0 %v2586_v1  ;;  %2374 = vmatprep.subr.bf16.mxu1 %v2586_v1 }
 0x1d3   : > { %2265 = vmatpush3.bf16.msra.mxu0 %v2539_v8  ;;  %2375 = vmatpush3.bf16.msra.mxu1 %v2540_v43 }
 0x1d4   : > { %2270 = vmatprep.subr.bf16.mxu0 %v2586_v1  ;;  %2376 = vmatprep.subr.bf16.mxu1 %v2586_v1 }
 0x1d6   : > { %2267 = vmatmul.mubr.bf16.vlgmr.msra.gmra.mrb[4].mxu0 %v2865_v61  ;;  %v2545_v61 = vld [vmem:[%s3218_s4 + $0xd0] sm:$0xff]  }
 0x1d7   : > { %2271 = vmatpush3.bf16.msra.mxu0 %v2541_v12  ;;  %2377 = vmatpush3.bf16.msra.mxu1 %v2542_v13 }
 0x1d8   : > { %2272 = vmatprep.subr.bf16.mxu0 %v2586_v1  ;;  %2378 = vmatprep.subr.bf16.mxu1 %v2586_v1 }
 0x1d9   : > { %2286 = vmatprep.mubr.msk.bf16.mxu0 %vm2587_vm0, %v2586_v1 }
 0x1db   : > { %2273 = vmatpush3.bf16.msra.mxu0 %v2543_v14  ;;  %2379 = vmatpush3.bf16.msra.mxu1 %v2544_v15 }
 0x1dc   : > { %2274 = vmatprep.subr.bf16.mxu0 %v2586_v1  ;;  %2380 = vmatprep.subr.bf16.mxu1 %v2586_v1 }
 0x1df   : > { %2275 = vmatpush3.bf16.msra.mxu0 %v2545_v61  ;;  %2381 = vmatpush3.bf16.msra.mxu1 %v2546_v16 }
 0x1e0   : > { %2276 = vmatprep.subr.bf16.mxu0 %v2586_v1  ;;  %2382 = vmatprep.subr.bf16.mxu1 %v2586_v1 }
 0x1e3   : > { %2277 = vmatpush3.bf16.msra.mxu0 %v2547_v17  ;;  %2383 = vmatpush3.bf16.msra.mxu1 %v2548_v18 }
 0x1e4   : > { %2278 = vmatprep.subr.bf16.mxu0 %v2586_v1  ;;  %2384 = vmatprep.subr.bf16.mxu1 %v2586_v1 }
 0x1e7   : > { %2279 = vmatpush3.bf16.msra.mxu0 %v2549_v19  ;;  %2385 = vmatpush3.bf16.msra.mxu1 %v2550_v21 }
 0x1e8   : > { %2280 = vmatprep.subr.bf16.mxu0 %v2586_v1  ;;  %2390 = vmatprep.subr.bf16.mxu1 %v2586_v1 }
 0x1ea   : > { %2387 = vmatmul.mubr.bf16.vlgmr.msra.gmra.mrb[0].mxu1 %v2892_v11  ;;  %v2555_v11 = vld [vmem:[%s3218_s4 + $0xf8] sm:$0xff]  }
 0x1eb   : > { %2281 = vmatpush3.bf16.msra.mxu0 %v2551_v22  ;;  %2391 = vmatpush3.bf16.msra.mxu1 %v2552_v23 }
 0x1ec   : > { %2282 = vmatprep.subr.bf16.mxu0 %v2586_v1  ;;  %2392 = vmatprep.subr.bf16.mxu1 %v2586_v1 }
 0x1ed   : > { %2406 = vmatprep.mubr.msk.bf16.mxu1 %vm2587_vm0, %v2586_v1 }
 0x1ef   : > { %2283 = vmatpush3.bf16.msra.mxu0 %v2553_v24  ;;  %2393 = vmatpush3.bf16.msra.mxu1 %v2554_v25 }
 0x1f0   : > { %2284 = vmatprep.subr.bf16.mxu0 %v2586_v1  ;;  %2394 = vmatprep.subr.bf16.mxu1 %v2586_v1 }
 0x1f3   : > { %2285 = vmatpush3.bf16.msra.mxu0 %v2555_v11  ;;  %2395 = vmatpush3.bf16.msra.mxu1 %v2556_v27 }
 0x1f4   : > { %2290 = vmatprep.subr.bf16.mxu0 %v2586_v1  ;;  %2396 = vmatprep.subr.bf16.mxu1 %v2586_v1 }
 0x1f6   : > { %2287 = vmatmul.mubr.bf16.vlgmr.msra.gmra.mrb[4].mxu0 %v2926_v45  ;;  %v2570_v45 = vld [vmem:[%s3218_s4 + $0x288] sm:$0xff]  }
 0x1f7   : > { %2291 = vmatpush3.bf16.msra.mxu0 %v2557_v28  ;;  %2397 = vmatpush3.bf16.msra.mxu1 %v2558_v29 }
 0x1f8   : > { %2292 = vmatprep.subr.bf16.mxu0 %v2586_v1  ;;  %2398 = vmatprep.subr.bf16.mxu1 %v2586_v1 }
 0x1f9   : > { %2306 = vmatprep.mubr.msk.bf16.mxu0 %vm2587_vm0, %v2586_v1 }
 0x1fb   : > { %2293 = vmatpush3.bf16.msra.mxu0 %v2559_v31  ;;  %2399 = vmatpush3.bf16.msra.mxu1 %v2560_v32 }
 0x1fc   : > { %2294 = vmatprep.subr.bf16.mxu0 %v2586_v1  ;;  %2400 = vmatprep.subr.bf16.mxu1 %v2586_v1 }
 0x1ff   : > { %2295 = vmatpush3.bf16.msra.mxu0 %v2561_v33  ;;  %2401 = vmatpush3.bf16.msra.mxu1 %v2562_v34 }
 0x200   : > { %2296 = vmatprep.subr.bf16.mxu0 %v2586_v1  ;;  %2402 = vmatprep.subr.bf16.mxu1 %v2586_v1 }
 0x203   : > { %2297 = vmatpush3.bf16.msra.mxu0 %v2563_v35  ;;  %2403 = vmatpush3.bf16.msra.mxu1 %v2564_v36 }
 0x204   : > { %2298 = vmatprep.subr.bf16.mxu0 %v2586_v1  ;;  %2404 = vmatprep.subr.bf16.mxu1 %v2586_v1 }
 0x207   : > { %2299 = vmatpush3.bf16.msra.mxu0 %v2565_v37  ;;  %2405 = vmatpush3.bf16.msra.mxu1 %v2566_v39 }
 0x208   : > { %2300 = vmatprep.subr.bf16.mxu0 %v2586_v1  ;;  %2410 = vmatprep.subr.bf16.mxu1 %v2586_v1 }
 0x20a   : > { %2407 = vmatmul.mubr.bf16.vlgmr.msra.gmra.mrb[0].mxu1 %v2918_v38  ;;  %v2571_v38 = vld [vmem:[%s3218_s4 + $0x138] sm:$0xff]  }
 0x20b   : > { %2301 = vmatpush3.bf16.msra.mxu0 %v2567_v40  ;;  %2411 = vmatpush3.bf16.msra.mxu1 %v2568_v41 }
 0x20c   : > { %2302 = vmatprep.subr.bf16.mxu0 %v2586_v1  ;;  %2412 = vmatprep.subr.bf16.mxu1 %v2586_v1 }
 0x20d   : > { %2426 = vmatprep.mubr.msk.bf16.mxu1 %vm2587_vm0, %v2586_v1 }
 0x20f   : > { %2303 = vmatpush3.bf16.msra.mxu0 %v2569_v44  ;;  %2413 = vmatpush3.bf16.msra.mxu1 %v2570_v45 }
 0x210   : > { %2304 = vmatprep.subr.bf16.mxu0 %v2586_v1  ;;  %2414 = vmatprep.subr.bf16.mxu1 %v2586_v1 }
 0x213   : > { %2305 = vmatpush3.bf16.msra.mxu0 %v2571_v38  ;;  %2415 = vmatpush3.bf16.msra.mxu1 %v2572_v46 }
 0x214   : > { %2416 = vmatprep.subr.bf16.mxu1 %v2586_v1 }
 0x216   : > { %2307 = vmatmul.mubr.bf16.vlgmr.msra.gmra.mrb[4].mxu0 %v2818_v30  ;;  %v2577_v30 = vld [vmem:[%s3218_s4 + $0x2b8] sm:$0xff]  }
 0x217   : > { %2417 = vmatpush3.bf16.msra.mxu1 %v2573_v47 }
 0x218   : > { %2418 = vmatprep.subr.bf16.mxu1 %v2586_v1 }
 0x21b   : > { %2419 = vmatpush3.bf16.msra.mxu1 %v2574_v48 }
 0x21c   : > { %2420 = vmatprep.subr.bf16.mxu1 %v2586_v1 }
 0x21f   : > { %2421 = vmatpush3.bf16.msra.mxu1 %v2575_v49 }
 0x220   : > { %2422 = vmatprep.subr.bf16.mxu1 %v2586_v1 }
 0x223   : > { %2423 = vmatpush3.bf16.msra.mxu1 %v2576_v50 }
 0x224   : > { %2424 = vmatprep.subr.bf16.mxu1 %v2586_v1 }
 0x227   : > { %2425 = vmatpush3.bf16.msra.mxu1 %v2577_v30 }
 0x22a   : > { %2427 = vmatmul.mubr.bf16.vlgmr.msra.gmra.mrb[0].mxu1 %v477_v55 }
 0x2e9   : > { %v1107_v51 = vpop.f32.mrb[4].mxu0 }
 0x2ea   : > { %v2308_v52 = vpop.f32.mrb[5].mxu0 }
 0x2eb   : > { %v1110_v26 = vpop.f32.mrb[6].mxu0 }
 0x2ec   : > { %v2309_v56 = vpop.f32.mrb[7].mxu0 }
 0x2fd   : > { %v1816_v57 = vpop.f32.mrb[0].mxu1 }
 0x2fe   : > { %v2430_v58 = vadd.f32 %v1816_v57, %v1107_v51  ;;  %v2428_v59 = vpop.f32.mrb[1].mxu1 }
 0x2ff   : > { %v1819_v60 = vpop.f32.mrb[2].mxu1 }
 0x300   : > { %v2431_v62 = vadd.f32 %v1819_v60, %v1110_v26  ;;  %v2429_v63 = vpop.f32.mrb[3].mxu1  ;;  %v1833_v1 = vmul.f32 %v2430_v58, %v2430_v58 }
 0x302   : > { %v1825_v0 = vadd.f32 %v2431_v62, %v2430_v58  ;;  %v1834_v53 = vmul.f32 %v2431_v62, %v2431_v62  ;;  %v2080_v54 = vpack.c.bf16 %v2431_v62, %v2430_v58 }
 0x304   : > { %v1826_v55 = vrot.slane %v1825_v0, 4  ;;  %v1835_v42 = vadd.f32 %v1834_v53, %v1833_v1  ;;  %2081 = vst [vmem:[%s289_s30] sm:$0xff] %v2080_v54  }
 0x306   : > { %v1827_v2 = vadd.f32 %v1826_v55, %v1825_v0  ;;  %v1836_v20 = vrot.slane %v1835_v42, 4 }
 0x308   : > { %v1828_v3 = vrot.slane %v1827_v2, 2  ;;  %v1837_v4 = vadd.f32 %v1836_v20, %v1835_v42 }
 0x30a   : > { %v1829_v5 = vadd.f32 %v1828_v3, %v1827_v2  ;;  %v1838_v6 = vrot.slane %v1837_v4, 2 }
 0x30c   : > { %v1830_v7 = vrot.slane %v1829_v5, 1  ;;  %v1839_v9 = vadd.f32 %v1838_v6, %v1837_v4 }
 0x30e   : > { %v1831_v10 = vadd.f32 %v1830_v7, %v1829_v5  ;;  %v1840_v8 = vrot.slane %v1839_v9, 1 }
 0x310   : > { %1832 = vst [vmem:[%s292_s9] sm:$0x1] %v1831_v10  ;;  %v1841_v43 = vadd.f32 %v1840_v8, %v1839_v9 }
 0x312   : > { %1842 = vst [vmem:[%s295_s13] sm:$0x1] %v1841_v43 }
 0x313 PF: > { %s18_s24 = sadd.s32 1, %s2584_s24  }
 0x314   : > { %p15_p4 = scmp.ge.s32.totalorder %s18_s24, 4  }
 0x316   :  { %17 = sbr.rel (!%p15_p4) target bundleno = 1 (0x1), region = 94 }

</bundles_post_ra>
